<compile_context>
chip_gen: v6e
topology: v6e:2x2x1
jax: 0.10.0
libtpu: 0.0.40
codegen_flags: <defaults>
</compile_context>

<pallas_src>
import math

import numpy as np
import jax
import jax.numpy as jnp
from jax import lax
from jax.experimental import pallas as pl
from jax.experimental.pallas import tpu as pltpu

# 1e10 * e / (4 pi eps0)  (scipy.constants values baked in)
COULOMB_FACTOR = 1.0e10 * 1.602176634e-19 / (4.0 * math.pi * 8.8541878128e-12)

# Synthetic deterministic covalent-radii table (indexed by atomic number, Angstrom).
_COVALENT_RADII = np.full(119, 1.0, dtype=np.float64)
_COVALENT_RADII[1] = 0.31   # H
_COVALENT_RADII[6] = 0.76   # C
_COVALENT_RADII[8] = 0.66   # O

# Explicit scoped-VMEM limit: well above the 16/32 MiB defaults, well below v7x's
# 64 MiB physical capacity (leaves headroom for pipeline double-buffering).
_VMEM_LIMIT_BYTES = 40 * 1024 * 1024


def _round_up(x, m):
    return ((x + m - 1) // m) * m


# ----------------------------------------------------------------------------------
# host-side (numpy) helpers: data-dependent shift grids -> static shapes for Pallas
# ----------------------------------------------------------------------------------
def _shifts_within_cutoff(cell, cutoff):
    nx = np.cross(cell[1], cell[2])
    ny = np.cross(cell[2], cell[0])
    nz = np.cross(cell[0], cell[1])
    proj = np.array([
        np.dot(cell[0], nx / np.linalg.norm(nx)),
        np.dot(cell[1], ny / np.linalg.norm(ny)),
        np.dot(cell[2], nz / np.linalg.norm(nz)),
    ])
    s = np.ceil(cutoff / np.abs(proj))
    rx = np.arange(-s[0], s[0] + 1)
    ry = np.arange(-s[1], s[1] + 1)
    rz = np.arange(-s[2], s[2] + 1)
    gx, gy, gz = np.meshgrid(rx, ry, rz, indexing="ij")
    return np.stack([gx.ravel(), gy.ravel(), gz.ravel()], axis=-1)


# ----------------------------------------------------------------------------------
# Pallas kernels
# ----------------------------------------------------------------------------------
def _erfc_shared(x, x2):
    """erfc(x) with x2 == x*x supplied by the caller (A&S 7.1.26, valid for x >= 0)."""
    d = 1.0 + 0.3275911 * x
    t = pl.reciprocal(d, approx=True)     # EUP approx reciprocal
    t = t * (2.0 - d * t)                 # one Newton step -> ~f32 accuracy on VPU
    poly = t * (0.254829592 + t * (-0.284496736 + t * (1.421413741
                + t * (-1.453152027 + t * 1.061405429))))
    return poly * jnp.exp(-x2)


def _make_real_kernel(eta, cutoff_real, eps, coulomb, s_chunk, n_chunks):
    a = 1.0 / (math.sqrt(2.0) * eta)
    a2 = a * a
    cutoff2 = cutoff_real * cutoff_real
    eps2 = eps * eps
    unroll = bool(n_chunks <= 8)

    def kernel(disp_ref, bcoef_ref, diag_ref, shift_ref, out_ref):
        # disp_ref : (8, tile_p)   rows 0..2 = pair displacement, rows 3..7 = 0
        # bcoef_ref: (1, tile_p)   1 / (sqrt(2) * gamma_ij)   (host precomputed)
        # diag_ref : (1, tile_p)   self-energy + hardness scattered on the diagonal
        # shift_ref: (s_pad, 8)    cols 0..2 = lattice shift, col 3 = |shift|^2,
        #                          cols 4..7 = 0 (so the MXU dot below is untouched)
        disp = disp_ref[...]
        dx = disp[0:1, :]
        dy = disp[1:2, :]
        dz = disp[2:3, :]
        d2 = dx * dx + dy * dy + dz * dz          # (1, tile_p)
        b = bcoef_ref[...]                        # (1, tile_p)
        b2 = b * b

        def body(c, acc):
            off = pl.multiple_of(c * s_chunk, s_chunk)
            sh = shift_ref[pl.ds(off, s_chunk), :]                 # (s_chunk, 8)
            s2 = sh[:, 3:4]                                        # (s_chunk, 1)
            # cross = shift . disp on the MXU (disp rows 3..7 are zero, so the |s|^2
            # column in sh does not perturb the contraction).
            cross = jnp.dot(sh, disp, preferred_element_type=jnp.float32)
            r2 = d2 + 2.0 * cross + s2                             # (s_chunk, tile_p)
            mask = (r2 > eps2) & (r2 < cutoff2)
            r2s = jnp.where(mask, r2, 1.0)
            inv_dist = lax.rsqrt(r2s)
            dist = r2s * inv_dist
            # NOTE: the erfc difference cancels in f32 for very small distances; the
            # f64 reference does not see this (acceptable at kernel precision).
            term = (_erfc_shared(dist * a, r2s * a2)
                    - _erfc_shared(dist * b, r2s * b2))
            contrib = jnp.where(mask, term * inv_dist, 0.0)
            return acc + jnp.sum(contrib, axis=0, keepdims=True)

        acc = lax.fori_loop(0, n_chunks, body,
                            jnp.zeros(out_ref.shape, jnp.float32),
                            unroll=unroll)
        out_ref[...] = coulomb * acc + diag_ref[...]

    return kernel


def _make_recip_kernel(prefactor):
    def kernel(ks_ref, kw_ref, pos_ref, out_ref):
        # ks_ref : (k_pad, 8)   cols 0..2 = k-vector, cols 3..7 = 0
        # kw_ref : (k_pad, 1)   exp(-(eta|k|)^2/2)/|k|^2, 0 for masked/padded k
        # pos_ref: (8, n_lane)  rows 0..2 = atom positions (transposed), rest 0
        phases = jnp.dot(ks_ref[...], pos_ref[...],
                         preferred_element_type=jnp.float32)       # (k_pad, n_lane)
        kw = kw_ref[...]                                           # (k_pad, 1)
        c = jnp.cos(phases)
        s = jnp.sin(phases)
        cw = c * kw
        sw = s * kw
        dn = (((0,), (0,)), ((), ()))                              # contract over k
        e = lax.dot_general(c, cw, dimension_numbers=dn,
                            preferred_element_type=jnp.float32)
        e = e + lax.dot_general(s, sw, dimension_numbers=dn,
                                preferred_element_type=jnp.float32)
        out_ref[...] = prefactor * e

    return kernel


# ----------------------------------------------------------------------------------
# wrappers
# ----------------------------------------------------------------------------------
def ewald_qeq_matrix(pos, sigmas, hardness, cell, accuracy=1e-8, eps=1e-8):
    """Returns the (N, N) QEQ energy matrix (real + reciprocal + self + hardness diag)."""
    pos = np.asarray(pos, dtype=np.float64)
    cell = np.asarray(cell, dtype=np.float64)
    sigmas = np.asarray(sigmas, dtype=np.float64).reshape(-1)
    hardness = np.asarray(hardness, dtype=np.float64).reshape(-1)
    n = pos.shape[0]
    p = n * n

    volume = abs(np.dot(cell[0], np.cross(cell[1], cell[2])))
    eta = (volume ** 2 / n) ** (1.0 / 6.0) / math.sqrt(2.0 * math.pi)
    cutoff_real = math.sqrt(-2.0 * math.log(accuracy)) * eta
    cutoff_recip = math.sqrt(-2.0 * math.log(accuracy)) / eta

    # ---- real-space lattice shifts: (s_pad, 8), column 3 holds |shift|^2 ----
    shift_disp = _shifts_within_cutoff(cell, cutoff_real) @ cell          # (S, 3)
    s_n = shift_disp.shape[0]
    s_chunk = 64 if s_n >= 64 else _round_up(s_n, 8)
    s_pad = _round_up(s_n, s_chunk)
    shift8 = np.zeros((s_pad, 8), dtype=np.float64)
    shift8[:s_n, :3] = shift_disp
    shift8[s_n:, :3] = 1.0e6            # padded shifts land far outside the cutoff
    shift8[:, 3] = np.sum(shift8[:, :3] ** 2, axis=1)

    # ---- reciprocal k-vectors + weights (padded k rows get zero weight) ----
    recip = 2.0 * math.pi * np.linalg.inv(cell).T
    ks_all = _shifts_within_cutoff(recip, cutoff_recip) @ recip
    klen = np.linalg.norm(ks_all, axis=-1)
    kvalid = (klen > eps) & (klen < cutoff_recip)
    klen_safe = np.where(kvalid, klen, 1.0)
    kweight = np.where(kvalid,
                       np.exp(-0.5 * (eta * klen_safe) ** 2) / (klen_safe ** 2), 0.0)
    k_n = ks_all.shape[0]
    k_pad = _round_up(k_n, 256)         # full MXU width on v6e / v7x
    ks8 = np.zeros((k_pad, 8), dtype=np.float64)
    ks8[:k_n, :3] = ks_all
    kw_col = np.zeros((k_pad, 1), dtype=np.float64)
    kw_col[:k_n, 0] = kweight

    # ---- flattened pair axis p = i*N + j along lanes, lane-dense tiles ----
    p_pad = _round_up(p, 128)
    tile_p = min(2048, p_pad)           # sized so (s_chunk, tile_p) fits v7x VMEM too
    p_pad = _round_up(p_pad, tile_p)

    disp_ij = pos[None, :, :] - pos[:, None, :]                           # (N, N, 3)
    disp8 = np.zeros((8, p_pad), dtype=np.float64)
    disp8[:3, :p] = disp_ij.reshape(p, 3).T

    gamma = np.sqrt(sigmas[:, None] ** 2 + sigmas[None, :] ** 2).reshape(p)
    bcoef = np.ones((1, p_pad), dtype=np.float64)
    bcoef[0, :p] = 1.0 / (math.sqrt(2.0) * gamma)

    # self-energy (point_charge=False) + hardness on the diagonal, as a flat (1, P) row
    self_diag = COULOMB_FACTOR * (-math.sqrt(2.0 / math.pi) / eta
                                  + 1.0 / (math.sqrt(math.pi) * sigmas))
    diag_flat = np.zeros((1, p_pad), dtype=np.float64)
    diag_flat[0, np.arange(n) * (n + 1)] = self_diag + hardness

    # ---- positions for the structure-factor reciprocal kernel ----
    n_lane = _round_up(n, 128)
    pos8 = np.zeros((8, n_lane), dtype=np.float64)
    pos8[:3, :n] = pos.T

    recip_prefactor = COULOMB_FACTOR * 4.0 * math.pi / volume
    f32 = lambda arr: jnp.asarray(arr, dtype=jnp.float32)

    # ---- real-space + diagonal kernel: grid over lane-dense pair tiles ----
    real_kernel = _make_real_kernel(float(eta), float(cutoff_real), float(eps),
                                    float(COULOMB_FACTOR), s_chunk, s_pad // s_chunk)
    real_out = pl.pallas_call(
        real_kernel,
        out_shape=jax.ShapeDtypeStruct((1, p_pad), jnp.float32),
        grid=(p_pad // tile_p,),
        in_specs=[
            pl.BlockSpec((8, tile_p), lambda i: (0, i)),
            pl.BlockSpec((1, tile_p), lambda i: (0, i)),
            pl.BlockSpec((1, tile_p), lambda i: (0, i)),
            pl.BlockSpec((s_pad, 8), lambda i: (0, 0)),   # resident across all tiles
        ],
        out_specs=pl.BlockSpec((1, tile_p), lambda i: (0, i)),
        compiler_params=pltpu.CompilerParams(
            dimension_semantics=("parallel",),
            vmem_limit_bytes=_VMEM_LIMIT_BYTES),
    )(f32(disp8), f32(bcoef), f32(diag_flat), f32(shift8))

    # ---- reciprocal kernel: structure factors + two MXU matmuls over k ----
    vmem = pl.BlockSpec(memory_space=pltpu.MemorySpace.VMEM)
    recip_out = pl.pallas_call(
        _make_recip_kernel(float(recip_prefactor)),
        out_shape=jax.ShapeDtypeStruct((n_lane, n_lane), jnp.float32),
        in_specs=[vmem, vmem, vmem],
        out_specs=vmem,
        compiler_params=pltpu.CompilerParams(vmem_limit_bytes=_VMEM_LIMIT_BYTES),
    )(f32(ks8), f32(kw_col), f32(pos8))

    e_real = real_out[0, :p].reshape(n, n)     # includes self-energy + hardness diag
    return e_real + recip_out[:n, :n]


class EwaldQeqPallas:
    """JAX/Pallas re-implementation of EwaldQeq.forward (point_charge=False path)."""

    def __init__(self, allowed_species, hidden_dim, scale=1.0, key=None):
        self.scale = scale
        self.allowed_species = np.asarray(allowed_species)
        self.sigma = _COVALENT_RADII[self.allowed_species]          # (num_species,)
        if key is None:
            key = jax.random.PRNGKey(0)
        # to_chi: Linear(node_features -> 1x0e), deterministic synthetic init
        self.chi_weight = (jax.random.normal(key, (hidden_dim, 1), dtype=jnp.float32)
                           / math.sqrt(hidden_dim))
        # to_hardness parameter initialized to ones (as in the module __init__)
        self.to_hardness = np.ones(len(allowed_species), dtype=np.float64)

    def forward(self, data):
        species_idx = np.asarray(data["species_index"])
        sigmas = self.sigma[species_idx]                            # (N_total,)
        hardness = np.square(self.to_hardness)[species_idx]         # (N_total,)

        # chi = node_features @ W (hidden -> 1): per the perf review this matmul is
        # far too small to justify a dedicated Pallas kernel; leave it to XLA.
        chi = jnp.dot(jnp.asarray(data["node_features"], jnp.float32),
                      self.chi_weight)                              # (N_total, 1)

        ptr = np.asarray(data["ptr"])
        batch_size = ptr.shape[0] - 1
        charges = []
        ele = []
        for bi in range(batch_size):
            lo, hi = int(ptr[bi]), int(ptr[bi + 1])
            n = hi - lo
            cell_bi = np.asarray(data["cell"][bi])
            pos_bi = np.asarray(data["pos"][lo:hi])

            # NOTE: recompiles for every distinct (n, S, K) structure shape; fine for
            # this demo, shape bucketing would amortize it for real batches.
            e_matrix = ewald_qeq_matrix(pos_bi, sigmas[lo:hi], hardness[lo:hi], cell_bi)

            coeffs = jnp.ones((n + 1, n + 1), dtype=jnp.float32)
            coeffs = coeffs.at[:n, :n].set(e_matrix)
            coeffs = coeffs.at[-1, -1].set(0.0)

            chi_bi = chi[lo:hi]                                     # (n, 1)
            total_charge_bi = jnp.asarray([[float(data["total_charge"][bi])]],
                                          dtype=jnp.float32)        # (1, 1)
            rhs = jnp.concatenate([-chi_bi, total_charge_bi], axis=0)   # (n+1, 1)

            # TODO(synk): dense LU solve has no clean Pallas TPU equivalent; use jnp.linalg.solve.
            sol = jnp.linalg.solve(coeffs[None], rhs[None])         # (1, n+1, 1)
            q = jnp.squeeze(sol, axis=0)[:-1]                       # (n, 1)
            charges.append(q)

            # reproduce the PyTorch broadcasting exactly: q is (n,1), so the product
            # broadcasts to (n, n, n) before the sum, as in the reference module.
            e_qeq = 0.5 * jnp.sum(e_matrix * q[:, None] * q[None, :])
            e_qeq = e_qeq + jnp.sum(q * chi_bi)
            ele.append(e_qeq / self.scale)

        out = dict(data)
        out["charges"] = jnp.concatenate(charges, axis=0)           # (N_total, 1)
        out["electrostatic_energy"] = jnp.stack(ele)[:, None]       # (batch, 1)
        return out


if __name__ == "__main__":
    key = jax.random.PRNGKey(0)
    k_feat, k_pos, k_spec = jax.random.split(key, 3)

    allowed_species = [1, 6, 8]
    hidden = 32
    n_per_structure = 8
    batch = 2
    n_total = n_per_structure * batch

    ptr = np.array([0, n_per_structure, 2 * n_per_structure], dtype=np.int64)
    cells = np.stack([6.0 * np.eye(3), 6.5 * np.eye(3)]).astype(np.float64)   # (2, 3, 3)
    pos = np.asarray(jax.random.uniform(k_pos, (n_total, 3), dtype=jnp.float32)) * 6.0
    species_idx = np.asarray(
        jax.random.randint(k_spec, (n_total,), 0, len(allowed_species)))
    node_features = jax.random.normal(k_feat, (n_total, hidden), dtype=jnp.float32)
    total_charge = np.array([0.0, 1.0], dtype=np.float64)

    data = dict(
        pos=pos,
        cell=cells,
        species_index=species_idx,
        ptr=ptr,
        node_features=node_features,
        total_charge=total_charge,
    )

    model = EwaldQeqPallas(allowed_species, hidden_dim=hidden, scale=1.0,
                           key=jax.random.PRNGKey(42))
    out = model.forward(data)
    jax.block_until_ready(out["charges"])
    jax.block_until_ready(out["electrostatic_energy"])
    print("KERNEL_OK")
</pallas_src>

<mosaic_0001>
module attributes {stable_mosaic.version = 11 : i64} {
  func.func @kernel(%arg0: i32, %arg1: memref<8x128xf32, #tpu.memory_space<vmem>>, %arg2: memref<1x128xf32, #tpu.memory_space<vmem>>, %arg3: memref<1x128xf32, #tpu.memory_space<vmem>>, %arg4: memref<128x8xf32, #tpu.memory_space<vmem>>, %arg5: memref<1x128xf32, #tpu.memory_space<vmem>>) attributes {dimension_semantics = [#tpu.dimension_semantics<parallel>], iteration_bounds = array<i64: 1>, scalar_prefetch = 0 : i64, scratch_operands = 0 : i64, tpu.core_type = #tpu.core_type<tc>, window_params = [{transform_indices = @transform_0, window_bounds = array<i64: 8, 128>}, {transform_indices = @transform_1, window_bounds = array<i64: 1, 128>}, {transform_indices = @transform_2, window_bounds = array<i64: 1, 128>}, {pipeline_mode = #tpu.pipeline_mode<synchronous>, transform_indices = @transform_3, window_bounds = array<i64: 128, 8>}, {transform_indices = @transform_4, window_bounds = array<i64: 1, 128>}]} {
    %c0 = arith.constant 0 : index
    %c0_0 = arith.constant 0 : index
    %0 = vector.load %arg1[%c0, %c0_0] : memref<8x128xf32, #tpu.memory_space<vmem>>, vector<8x128xf32>
    %1 = vector.extract_strided_slice %0 {offsets = [0, 0], sizes = [1, 128], strides = [1, 1]} : vector<8x128xf32> to vector<1x128xf32>
    %2 = vector.extract_strided_slice %0 {offsets = [1, 0], sizes = [1, 128], strides = [1, 1]} : vector<8x128xf32> to vector<1x128xf32>
    %3 = vector.extract_strided_slice %0 {offsets = [2, 0], sizes = [1, 128], strides = [1, 1]} : vector<8x128xf32> to vector<1x128xf32>
    %4 = arith.mulf %1, %1 : vector<1x128xf32>
    %5 = arith.mulf %2, %2 : vector<1x128xf32>
    %6 = arith.addf %4, %5 : vector<1x128xf32>
    %7 = arith.mulf %3, %3 : vector<1x128xf32>
    %8 = arith.addf %6, %7 : vector<1x128xf32>
    %c0_1 = arith.constant 0 : index
    %c0_2 = arith.constant 0 : index
    %9 = vector.load %arg2[%c0_1, %c0_2] : memref<1x128xf32, #tpu.memory_space<vmem>>, vector<1x128xf32>
    %10 = arith.mulf %9, %9 : vector<1x128xf32>
    %cst = arith.constant 0.000000e+00 : f32
    %11 = vector.broadcast %cst : f32 to vector<1x128xf32>
    %c0_i32 = arith.constant 0 : i32
    %c64_i32 = arith.constant 64 : i32
    %12 = arith.muli %c0_i32, %c64_i32 : i32
    %13 = tpu.assume_multiple %12, 64 : i32
    %14 = arith.index_cast %13 : i32 to index
    %c0_3 = arith.constant 0 : index
    %15 = vector.load %arg4[%14, %c0_3] : memref<128x8xf32, #tpu.memory_space<vmem>>, vector<64x8xf32>
    %16 = vector.extract_strided_slice %15 {offsets = [0, 3], sizes = [64, 1], strides = [1, 1]} : vector<64x8xf32> to vector<64x1xf32>
    %cst_4 = arith.constant dense<0.000000e+00> : vector<64x128xf32>
    %17 = tpu.matmul %15, %0, %cst_4 {dimension_numbers = #tpu.dot_dimension_numbers<[1], [0], [0], [1], [0, 0, 1, 1], [], []>} : vector<64x8xf32>, vector<8x128xf32>, vector<64x128xf32> -> vector<64x128xf32>
    %cst_5 = arith.constant 2.000000e+00 : f32
    %18 = vector.broadcast %cst_5 : f32 to vector<64x128xf32>
    %19 = arith.mulf %18, %17 : vector<64x128xf32>
    %20 = vector.broadcast %8 : vector<1x128xf32> to vector<64x128xf32>
    %21 = arith.addf %20, %19 : vector<64x128xf32>
    %22 = vector.broadcast %16 : vector<64x1xf32> to vector<64x128xf32>
    %23 = arith.addf %21, %22 : vector<64x128xf32>
    %cst_6 = arith.constant 1.000000e-16 : f32
    %24 = vector.broadcast %cst_6 : f32 to vector<64x128xf32>
    %25 = arith.cmpf ogt, %23, %24 : vector<64x128xf32>
    %cst_7 = arith.constant 105.542725 : f32
    %26 = vector.broadcast %cst_7 : f32 to vector<64x128xf32>
    %27 = arith.cmpf olt, %23, %26 : vector<64x128xf32>
    %28 = arith.andi %25, %27 : vector<64x128xi1>
    %cst_8 = arith.constant 1.000000e+00 : f32
    %29 = vector.broadcast %cst_8 : f32 to vector<64x128xf32>
    %30 = arith.select %28, %23, %29 : vector<64x128xi1>, vector<64x128xf32>
    %31 = math.rsqrt %30 : vector<64x128xf32>
    %32 = arith.mulf %30, %31 : vector<64x128xf32>
    %cst_9 = arith.constant 0.417771369 : f32
    %33 = vector.broadcast %cst_9 : f32 to vector<64x128xf32>
    %34 = arith.mulf %32, %33 : vector<64x128xf32>
    %cst_10 = arith.constant 0.17453292 : f32
    %35 = vector.broadcast %cst_10 : f32 to vector<64x128xf32>
    %36 = arith.mulf %30, %35 : vector<64x128xf32>
    %cst_11 = arith.constant 0.327591091 : f32
    %37 = vector.broadcast %cst_11 : f32 to vector<64x128xf32>
    %38 = arith.mulf %37, %34 : vector<64x128xf32>
    %cst_12 = arith.constant 1.000000e+00 : f32
    %39 = vector.broadcast %cst_12 : f32 to vector<64x128xf32>
    %40 = arith.addf %39, %38 : vector<64x128xf32>
    %41 = tpu.reciprocal %40 {approx = true} : vector<64x128xf32> -> vector<64x128xf32>
    %42 = arith.mulf %40, %41 : vector<64x128xf32>
    %cst_13 = arith.constant 2.000000e+00 : f32
    %43 = vector.broadcast %cst_13 : f32 to vector<64x128xf32>
    %44 = arith.subf %43, %42 : vector<64x128xf32>
    %45 = arith.mulf %41, %44 : vector<64x128xf32>
    %cst_14 = arith.constant 1.06140542 : f32
    %46 = vector.broadcast %cst_14 : f32 to vector<64x128xf32>
    %47 = arith.mulf %45, %46 : vector<64x128xf32>
    %cst_15 = arith.constant -1.45315206 : f32
    %48 = vector.broadcast %cst_15 : f32 to vector<64x128xf32>
    %49 = arith.addf %48, %47 : vector<64x128xf32>
    %50 = arith.mulf %45, %49 : vector<64x128xf32>
    %cst_16 = arith.constant 1.42141378 : f32
    %51 = vector.broadcast %cst_16 : f32 to vector<64x128xf32>
    %52 = arith.addf %51, %50 : vector<64x128xf32>
    %53 = arith.mulf %45, %52 : vector<64x128xf32>
    %cst_17 = arith.constant -0.284496725 : f32
    %54 = vector.broadcast %cst_17 : f32 to vector<64x128xf32>
    %55 = arith.addf %54, %53 : vector<64x128xf32>
    %56 = arith.mulf %45, %55 : vector<64x128xf32>
    %cst_18 = arith.constant 0.254829586 : f32
    %57 = vector.broadcast %cst_18 : f32 to vector<64x128xf32>
    %58 = arith.addf %57, %56 : vector<64x128xf32>
    %59 = arith.mulf %45, %58 : vector<64x128xf32>
    %cst_19 = arith.constant 0.000000e+00 : f32
    %60 = vector.broadcast %cst_19 : f32 to vector<64x128xf32>
    %61 = arith.subf %60, %36 : vector<64x128xf32>
    %62 = math.exp %61 : vector<64x128xf32>
    %63 = arith.mulf %59, %62 : vector<64x128xf32>
    %64 = vector.broadcast %9 : vector<1x128xf32> to vector<64x128xf32>
    %65 = arith.mulf %32, %64 : vector<64x128xf32>
    %66 = vector.broadcast %10 : vector<1x128xf32> to vector<64x128xf32>
    %67 = arith.mulf %30, %66 : vector<64x128xf32>
    %cst_20 = arith.constant 0.327591091 : f32
    %68 = vector.broadcast %cst_20 : f32 to vector<64x128xf32>
    %69 = arith.mulf %68, %65 : vector<64x128xf32>
    %cst_21 = arith.constant 1.000000e+00 : f32
    %70 = vector.broadcast %cst_21 : f32 to vector<64x128xf32>
    %71 = arith.addf %70, %69 : vector<64x128xf32>
    %72 = tpu.reciprocal %71 {approx = true} : vector<64x128xf32> -> vector<64x128xf32>
    %73 = arith.mulf %71, %72 : vector<64x128xf32>
    %cst_22 = arith.constant 2.000000e+00 : f32
    %74 = vector.broadcast %cst_22 : f32 to vector<64x128xf32>
    %75 = arith.subf %74, %73 : vector<64x128xf32>
    %76 = arith.mulf %72, %75 : vector<64x128xf32>
    %cst_23 = arith.constant 1.06140542 : f32
    %77 = vector.broadcast %cst_23 : f32 to vector<64x128xf32>
    %78 = arith.mulf %76, %77 : vector<64x128xf32>
    %cst_24 = arith.constant -1.45315206 : f32
    %79 = vector.broadcast %cst_24 : f32 to vector<64x128xf32>
    %80 = arith.addf %79, %78 : vector<64x128xf32>
    %81 = arith.mulf %76, %80 : vector<64x128xf32>
    %cst_25 = arith.constant 1.42141378 : f32
    %82 = vector.broadcast %cst_25 : f32 to vector<64x128xf32>
    %83 = arith.addf %82, %81 : vector<64x128xf32>
    %84 = arith.mulf %76, %83 : vector<64x128xf32>
    %cst_26 = arith.constant -0.284496725 : f32
    %85 = vector.broadcast %cst_26 : f32 to vector<64x128xf32>
    %86 = arith.addf %85, %84 : vector<64x128xf32>
    %87 = arith.mulf %76, %86 : vector<64x128xf32>
    %cst_27 = arith.constant 0.254829586 : f32
    %88 = vector.broadcast %cst_27 : f32 to vector<64x128xf32>
    %89 = arith.addf %88, %87 : vector<64x128xf32>
    %90 = arith.mulf %76, %89 : vector<64x128xf32>
    %cst_28 = arith.constant 0.000000e+00 : f32
    %91 = vector.broadcast %cst_28 : f32 to vector<64x128xf32>
    %92 = arith.subf %91, %67 : vector<64x128xf32>
    %93 = math.exp %92 : vector<64x128xf32>
    %94 = arith.mulf %90, %93 : vector<64x128xf32>
    %95 = arith.subf %63, %94 : vector<64x128xf32>
    %96 = arith.mulf %95, %31 : vector<64x128xf32>
    %cst_29 = arith.constant 0.000000e+00 : f32
    %97 = vector.broadcast %cst_29 : f32 to vector<64x128xf32>
    %98 = arith.select %28, %96, %97 : vector<64x128xi1>, vector<64x128xf32>
    %cst_30 = arith.constant dense<0.000000e+00> : vector<128xf32>
    %99 = vector.multi_reduction <add>, %98, %cst_30 [0] : vector<64x128xf32> to vector<128xf32>
    %100 = vector.shape_cast %99 : vector<128xf32> to vector<1x128xf32>
    %101 = arith.addf %11, %100 : vector<1x128xf32>
    %c1_i32 = arith.constant 1 : i32
    %c64_i32_31 = arith.constant 64 : i32
    %102 = arith.muli %c1_i32, %c64_i32_31 : i32
    %103 = tpu.assume_multiple %102, 64 : i32
    %104 = arith.index_cast %103 : i32 to index
    %c0_32 = arith.constant 0 : index
    %105 = vector.load %arg4[%104, %c0_32] : memref<128x8xf32, #tpu.memory_space<vmem>>, vector<64x8xf32>
    %106 = vector.extract_strided_slice %105 {offsets = [0, 3], sizes = [64, 1], strides = [1, 1]} : vector<64x8xf32> to vector<64x1xf32>
    %cst_33 = arith.constant dense<0.000000e+00> : vector<64x128xf32>
    %107 = tpu.matmul %105, %0, %cst_33 {dimension_numbers = #tpu.dot_dimension_numbers<[1], [0], [0], [1], [0, 0, 1, 1], [], []>} : vector<64x8xf32>, vector<8x128xf32>, vector<64x128xf32> -> vector<64x128xf32>
    %cst_34 = arith.constant 2.000000e+00 : f32
    %108 = vector.broadcast %cst_34 : f32 to vector<64x128xf32>
    %109 = arith.mulf %108, %107 : vector<64x128xf32>
    %110 = vector.broadcast %8 : vector<1x128xf32> to vector<64x128xf32>
    %111 = arith.addf %110, %109 : vector<64x128xf32>
    %112 = vector.broadcast %106 : vector<64x1xf32> to vector<64x128xf32>
    %113 = arith.addf %111, %112 : vector<64x128xf32>
    %cst_35 = arith.constant 1.000000e-16 : f32
    %114 = vector.broadcast %cst_35 : f32 to vector<64x128xf32>
    %115 = arith.cmpf ogt, %113, %114 : vector<64x128xf32>
    %cst_36 = arith.constant 105.542725 : f32
    %116 = vector.broadcast %cst_36 : f32 to vector<64x128xf32>
    %117 = arith.cmpf olt, %113, %116 : vector<64x128xf32>
    %118 = arith.andi %115, %117 : vector<64x128xi1>
    %cst_37 = arith.constant 1.000000e+00 : f32
    %119 = vector.broadcast %cst_37 : f32 to vector<64x128xf32>
    %120 = arith.select %118, %113, %119 : vector<64x128xi1>, vector<64x128xf32>
    %121 = math.rsqrt %120 : vector<64x128xf32>
    %122 = arith.mulf %120, %121 : vector<64x128xf32>
    %cst_38 = arith.constant 0.417771369 : f32
    %123 = vector.broadcast %cst_38 : f32 to vector<64x128xf32>
    %124 = arith.mulf %122, %123 : vector<64x128xf32>
    %cst_39 = arith.constant 0.17453292 : f32
    %125 = vector.broadcast %cst_39 : f32 to vector<64x128xf32>
    %126 = arith.mulf %120, %125 : vector<64x128xf32>
    %cst_40 = arith.constant 0.327591091 : f32
    %127 = vector.broadcast %cst_40 : f32 to vector<64x128xf32>
    %128 = arith.mulf %127, %124 : vector<64x128xf32>
    %cst_41 = arith.constant 1.000000e+00 : f32
    %129 = vector.broadcast %cst_41 : f32 to vector<64x128xf32>
    %130 = arith.addf %129, %128 : vector<64x128xf32>
    %131 = tpu.reciprocal %130 {approx = true} : vector<64x128xf32> -> vector<64x128xf32>
    %132 = arith.mulf %130, %131 : vector<64x128xf32>
    %cst_42 = arith.constant 2.000000e+00 : f32
    %133 = vector.broadcast %cst_42 : f32 to vector<64x128xf32>
    %134 = arith.subf %133, %132 : vector<64x128xf32>
    %135 = arith.mulf %131, %134 : vector<64x128xf32>
    %cst_43 = arith.constant 1.06140542 : f32
    %136 = vector.broadcast %cst_43 : f32 to vector<64x128xf32>
    %137 = arith.mulf %135, %136 : vector<64x128xf32>
    %cst_44 = arith.constant -1.45315206 : f32
    %138 = vector.broadcast %cst_44 : f32 to vector<64x128xf32>
    %139 = arith.addf %138, %137 : vector<64x128xf32>
    %140 = arith.mulf %135, %139 : vector<64x128xf32>
    %cst_45 = arith.constant 1.42141378 : f32
    %141 = vector.broadcast %cst_45 : f32 to vector<64x128xf32>
    %142 = arith.addf %141, %140 : vector<64x128xf32>
    %143 = arith.mulf %135, %142 : vector<64x128xf32>
    %cst_46 = arith.constant -0.284496725 : f32
    %144 = vector.broadcast %cst_46 : f32 to vector<64x128xf32>
    %145 = arith.addf %144, %143 : vector<64x128xf32>
    %146 = arith.mulf %135, %145 : vector<64x128xf32>
    %cst_47 = arith.constant 0.254829586 : f32
    %147 = vector.broadcast %cst_47 : f32 to vector<64x128xf32>
    %148 = arith.addf %147, %146 : vector<64x128xf32>
    %149 = arith.mulf %135, %148 : vector<64x128xf32>
    %cst_48 = arith.constant 0.000000e+00 : f32
    %150 = vector.broadcast %cst_48 : f32 to vector<64x128xf32>
    %151 = arith.subf %150, %126 : vector<64x128xf32>
    %152 = math.exp %151 : vector<64x128xf32>
    %153 = arith.mulf %149, %152 : vector<64x128xf32>
    %154 = vector.broadcast %9 : vector<1x128xf32> to vector<64x128xf32>
    %155 = arith.mulf %122, %154 : vector<64x128xf32>
    %156 = vector.broadcast %10 : vector<1x128xf32> to vector<64x128xf32>
    %157 = arith.mulf %120, %156 : vector<64x128xf32>
    %cst_49 = arith.constant 0.327591091 : f32
    %158 = vector.broadcast %cst_49 : f32 to vector<64x128xf32>
    %159 = arith.mulf %158, %155 : vector<64x128xf32>
    %cst_50 = arith.constant 1.000000e+00 : f32
    %160 = vector.broadcast %cst_50 : f32 to vector<64x128xf32>
    %161 = arith.addf %160, %159 : vector<64x128xf32>
    %162 = tpu.reciprocal %161 {approx = true} : vector<64x128xf32> -> vector<64x128xf32>
    %163 = arith.mulf %161, %162 : vector<64x128xf32>
    %cst_51 = arith.constant 2.000000e+00 : f32
    %164 = vector.broadcast %cst_51 : f32 to vector<64x128xf32>
    %165 = arith.subf %164, %163 : vector<64x128xf32>
    %166 = arith.mulf %162, %165 : vector<64x128xf32>
    %cst_52 = arith.constant 1.06140542 : f32
    %167 = vector.broadcast %cst_52 : f32 to vector<64x128xf32>
    %168 = arith.mulf %166, %167 : vector<64x128xf32>
    %cst_53 = arith.constant -1.45315206 : f32
    %169 = vector.broadcast %cst_53 : f32 to vector<64x128xf32>
    %170 = arith.addf %169, %168 : vector<64x128xf32>
    %171 = arith.mulf %166, %170 : vector<64x128xf32>
    %cst_54 = arith.constant 1.42141378 : f32
    %172 = vector.broadcast %cst_54 : f32 to vector<64x128xf32>
    %173 = arith.addf %172, %171 : vector<64x128xf32>
    %174 = arith.mulf %166, %173 : vector<64x128xf32>
    %cst_55 = arith.constant -0.284496725 : f32
    %175 = vector.broadcast %cst_55 : f32 to vector<64x128xf32>
    %176 = arith.addf %175, %174 : vector<64x128xf32>
    %177 = arith.mulf %166, %176 : vector<64x128xf32>
    %cst_56 = arith.constant 0.254829586 : f32
    %178 = vector.broadcast %cst_56 : f32 to vector<64x128xf32>
    %179 = arith.addf %178, %177 : vector<64x128xf32>
    %180 = arith.mulf %166, %179 : vector<64x128xf32>
    %cst_57 = arith.constant 0.000000e+00 : f32
    %181 = vector.broadcast %cst_57 : f32 to vector<64x128xf32>
    %182 = arith.subf %181, %157 : vector<64x128xf32>
    %183 = math.exp %182 : vector<64x128xf32>
    %184 = arith.mulf %180, %183 : vector<64x128xf32>
    %185 = arith.subf %153, %184 : vector<64x128xf32>
    %186 = arith.mulf %185, %121 : vector<64x128xf32>
    %cst_58 = arith.constant 0.000000e+00 : f32
    %187 = vector.broadcast %cst_58 : f32 to vector<64x128xf32>
    %188 = arith.select %118, %186, %187 : vector<64x128xi1>, vector<64x128xf32>
    %cst_59 = arith.constant dense<0.000000e+00> : vector<128xf32>
    %189 = vector.multi_reduction <add>, %188, %cst_59 [0] : vector<64x128xf32> to vector<128xf32>
    %190 = vector.shape_cast %189 : vector<128xf32> to vector<1x128xf32>
    %191 = arith.addf %101, %190 : vector<1x128xf32>
    %c2_i32 = arith.constant 2 : i32
    %cst_60 = arith.constant 14.3996458 : f32
    %192 = vector.broadcast %cst_60 : f32 to vector<1x128xf32>
    %193 = arith.mulf %192, %191 : vector<1x128xf32>
    %c0_61 = arith.constant 0 : index
    %c0_62 = arith.constant 0 : index
    %194 = vector.load %arg3[%c0_61, %c0_62] : memref<1x128xf32, #tpu.memory_space<vmem>>, vector<1x128xf32>
    %195 = arith.addf %193, %194 : vector<1x128xf32>
    %c0_63 = arith.constant 0 : index
    %c0_64 = arith.constant 0 : index
    %196 = vector.load %arg5[%c0_63, %c0_64] : memref<1x128xf32, #tpu.memory_space<vmem>>, vector<1x128xf32>
    tpu.vector_store %arg5[%c0_63, %c0_64], %195 {strides = array<i32>} : memref<1x128xf32, #tpu.memory_space<vmem>>, vector<1x128xf32>,
    return
  }
  func.func @transform_0(%arg0: i32) -> (i32, i32) {
    %c0_i32 = arith.constant 0 : i32
    %c0_i32_0 = arith.constant 0 : i32
    return %c0_i32, %arg0 : i32, i32
  }
  func.func @transform_1(%arg0: i32) -> (i32, i32) {
    %c0_i32 = arith.constant 0 : i32
    %c0_i32_0 = arith.constant 0 : i32
    return %c0_i32, %arg0 : i32, i32
  }
  func.func @transform_2(%arg0: i32) -> (i32, i32) {
    %c0_i32 = arith.constant 0 : i32
    %c0_i32_0 = arith.constant 0 : i32
    return %c0_i32, %arg0 : i32, i32
  }
  func.func @transform_3(%arg0: i32) -> (i32, i32) {
    %c0_i32 = arith.constant 0 : i32
    %c0_i32_0 = arith.constant 0 : i32
    %c0_i32_1 = arith.constant 0 : i32
    return %c0_i32, %c0_i32_0 : i32, i32
  }
  func.func @transform_4(%arg0: i32) -> (i32, i32) {
    %c0_i32 = arith.constant 0 : i32
    %c0_i32_0 = arith.constant 0 : i32
    return %c0_i32, %arg0 : i32, i32
  }
}

</mosaic_0001>

<bundles_post_ra>
// kernel: tpu_custom_call.1
= control target key start
LH: loop header
LB: loop body
LE: loop exit
PB: predicated region body
PF: predicated region fallthrough
CT: control target
= control target key end

     0   :  { %vm37_vm0 = vcmask 64512   ;;  %s2568_s0 = inlined_call_operand.vmem [shape: f32[8,128], index: 0, kind: input, shape index: {}]   ;;  %s2569_s1 = inlined_call_operand.vmem [shape: f32[1,128], index: 1, kind: input, shape index: {}]   ;;  %s2570_s2 = inlined_call_operand.vmem [shape: f32[1,128], index: 2, kind: input, shape index: {}]   ;;  %s2571_s3 = inlined_call_operand.vmem [shape: f32[128,8], index: 3, kind: input, shape index: {}]   ;;  %s2572_s4 = inlined_call_operand.hbm [shape: f32[1,128], index: 4, kind: output, shape index: {}]  }
   0x1   :  { %v18_v0 = vld [vmem:[%s2568_s0] sm:$0xff]  ;;  %v30_v3 = vld [vmem:[%s2571_s3 + $0x8] sm:$0xff]  ;;  %v31_v5 = vld [vmem:[%s2571_s3 + $0x10] sm:$0xff] }
   0x2   :  { %v29_v1 = vld [vmem:[%s2571_s3] sm:$0xff]  ;;  %1337 = vmatprep.subr.mxu0 %v18_v0  ;;  %1351 = vmatprep.subr.mxu1 %v18_v0  ;;  %v1304_v4 = vld [vmem:[%s2571_s3 + $0x48] sm:$0xff]  ;;  %v1305_v6 = vld [vmem:[%s2571_s3 + $0x50] sm:$0xff] }
   0x3   :  { %v1303_v2 = vld [vmem:[%s2571_s3 + $0x40] sm:$0xff]  ;;  %1338 = vmatpush3.msra.mxu0 %v18_v0  ;;  %1339 = vmatprep.mubr.msk.f32.mxu0 %vm37_vm0, %v29_v1  ;;  %v32_v7 = vld [vmem:[%s2571_s3 + $0x18] sm:$0xff] }
   0x4   :  { %1352 = vmatpush3.msra.mxu1 %v18_v0  ;;  %1353 = vmatprep.mubr.msk.f32.mxu1 %vm37_vm0, %v1303_v2  ;;  %v1306_v8 = vld [vmem:[%s2571_s3 + $0x58] sm:$0xff] }
   0x5   :  { %1340 = vmatmul.mubr.msk.f32.vlgmr.msra.gmra.mxu0 %vm37_vm0, %v30_v3  ;;  %1354 = vmatmul.mubr.msk.f32.vlgmr.msra.gmra.mxu1 %vm37_vm0, %v1304_v4 }
   0x6   :  { %1342 = vmatprep.mubr.msk.f32.mxu0 %vm37_vm0, %v31_v5  ;;  %1356 = vmatprep.mubr.msk.f32.mxu1 %vm37_vm0, %v1305_v6 }
   0x7   :  { %9 = vsyncpa [#allocation3], 0  ;;  %v33_v9 = vld [vmem:[%s2571_s3 + $0x20] sm:$0xff]  ;;  %v1551_v11 = vmov 3   ;;  %v34_v12 = vld [vmem:[%s2571_s3 + $0x28] sm:$0xff]  ;;  %v19_v18 = vmul.f32 %v18_v0, %v18_v0  ;;  %v175_v20 = vlaneseq  ;;  %v2602_v46 = vmov 0 }
   0x8   :  { %v1307_v10 = vld [vmem:[%s2571_s3 + $0x60] sm:$0xff]  ;;  %1368 = vset.pattern.permute.xlu1 %v1551_v11  ;;  %1367 = vset.pattern.permute.xlu0 %v1551_v11  ;;  %v1308_v13 = vld [vmem:[%s2571_s3 + $0x68] sm:$0xff]  ;;  %v35_v14 = vld [vmem:[%s2571_s3 + $0x30] sm:$0xff]  ;;  %v2605_v48 = vmov 0  ;;  %v2610_v54 = vmov 0  ;;  %s1552_s24 = smov [#allocation2]  }
   0x9   :  { %816 = vperm.xlu1 %1368, %v1303_v2   ;;  %188 = vperm.xlu0 %1367, %v29_v1   ;;  %v1309_v15 = vld [vmem:[%s2571_s3 + $0x70] sm:$0xff]  ;;  %v36_v16 = vld [vmem:[%s2571_s3 + $0x38] sm:$0xff]  ;;  %v21_v19 = vrot.slane %v19_v18, 1  ;;  %v24_v22 = vrot.slane %v19_v18, 2  ;;  %v176_v23 = vshrl.u32 %v175_v20, 7  ;;  %s1287_s0 = sshll.u32 %s1552_s24, 4  ;;  %s1288_s0 = int_to_ptr.vmem [resolvable:$true] %s1287_s0 }
   0xa   :  { %1343 = vmatmul.mubr.msk.f32.gmra.mxu0 %vm37_vm0, %v32_v7  ;;  %1357 = vmatmul.mubr.msk.f32.gmra.mxu1 %vm37_vm0, %v1306_v8  ;;  %v1310_v17 = vld [vmem:[%s2571_s3 + $0x78] sm:$0xff]  ;;  %v27_v1 = vld [vmem:[%s2569_s1] sm:$0x1]  ;;  %s1529_s25 = scalar_lea.vmem %s1288_s0, 16  ;;  %s1533_s26 = scalar_lea.vmem %s1288_s0, 32 }
   0xb   :  { %1345 = vmatprep.mubr.msk.f32.mxu0 %vm37_vm0, %v33_v9  ;;  %1359 = vmatprep.mubr.msk.f32.mxu1 %vm37_vm0, %v1307_v10  ;;  %v23_v21 = vadd.f32 %v21_v19, %v19_v18  ;;  %v1645_v25 = vsub.s32 0, %v176_v23  ;;  %v28_v20 = vmul.f32 %v27_v1, %v27_v1  ;;  %p1530_p0 = scmp.ne.s32.totalorder %s1288_s0, %s1529_s25  ;;  %p1534_p1 = scmp.lt.s32.totalorder %s1288_s0, %s1288_s0 }
   0xc   :  { %p1535_p2 = scmp.lt.s32.totalorder %s1533_s26, %s1529_s25 }
   0xd   :  { %820 = vperm.xlu1 %1368, %v1304_v4   ;;  %192 = vperm.xlu0 %1367, %v30_v3   ;;  %v26_v24 = vadd.f32 %v24_v22, %v23_v21 }
   0xe   :  { %1346 = vmatmul.mubr.msk.f32.gmra.mxu0 %vm37_vm0, %v34_v12  ;;  %1360 = vmatmul.mubr.msk.f32.gmra.mxu1 %vm37_vm0, %v1308_v13  ;;  %p1536_p3 = por %p1535_p2, %p1534_p1 }
   0xf   :  { %1348 = vmatprep.mubr.msk.f32.mxu0 %vm37_vm0, %v35_v14  ;;  %1362 = vmatprep.mubr.msk.f32.mxu1 %vm37_vm0, %v1309_v15  ;;  %v1648_v28 = vrot.slane %v26_v24, %v1645_v25 }
  0x10   :  { %p1537_p4 = pnand %p1536_p3, %p1530_p0 }
  0x11   :  { %824 = vperm.xlu1 %1368, %v1305_v6   ;;  %196 = vperm.xlu0 %1367, %v31_v5   ;;  %v1707_v5 = vrot.slane %v27_v1, %v1645_v25 }
  0x12   :  { %1349 = vmatmul.mubr.msk.f32.gmra.mxu0 %vm37_vm0, %v36_v16  ;;  %1363 = vmatmul.mubr.msk.f32.gmra.mxu1 %vm37_vm0, %v1310_v17 }
  0x13   :  { %2613 = vst [vmem:[#allocation8_spill] sm:$0xff] %v1707_v5 }
  0x15   :  { %828 = vperm.xlu1 %1368, %v1306_v8   ;;  %200 = vperm.xlu0 %1367, %v32_v7  }
  0x19   :  { %832 = vperm.xlu1 %1368, %v1307_v10   ;;  %204 = vperm.xlu0 %1367, %v33_v9  }
  0x1d   :  { %836 = vperm.xlu1 %1368, %v1308_v13   ;;  %208 = vperm.xlu0 %1367, %v34_v12  }
  0x21   :  { %840 = vperm.xlu1 %1368, %v1309_v15   ;;  %212 = vperm.xlu0 %1367, %v35_v14   ;;  %v2614_v15 = vmov 0 }
  0x25   :  { %844 = vperm.xlu1 %1368, %v1310_v17   ;;  %216 = vperm.xlu0 %1367, %v36_v16  }
  0x84   :  { %v817_v26 = vpop.permute.xlu1 %816  ;;  %v189_v27 = vpop.permute.xlu0 %188 }
  0x88   :  { %v821_v39 = vpop.permute.xlu1 %820  ;;  %v193_v40 = vpop.permute.xlu0 %192 }
  0x8c   :  { %v1685_v56 = vpop.permute.xlu0 %196  ;;  %v1712_v10 = vpop.permute.xlu1 %824 }
  0x90   :  { %v201_v61 = vpop.permute.xlu0 %200  ;;  %v829_v24 = vpop.permute.xlu1 %828 }
  0xc5   :  { %v1341_v29 = vpop.f32.mrf.mxu0  ;;  %v1355_v30 = vpop.f32.mrf.mxu1 }
  0xc6   :  { %v168_v31 = vmul.f32 2.0, %v1341_v29  ;;  %v800_v32 = vmul.f32 2.0, %v1355_v30 }
  0xc7   :  { %v128_v33 = vpop.f32.mrf.mxu0  ;;  %v760_v34 = vpop.f32.mrf.mxu1 }
  0xc8   :  { %v180_v35 = vadd.f32 %v1648_v28, %v168_v31  ;;  %v808_v36 = vadd.f32 %v800_v32, %v1648_v28  ;;  %v167_v37 = vmul.f32 2.0, %v128_v33  ;;  %v799_v38 = vmul.f32 2.0, %v760_v34 }
  0xca   :  { %v220_v41 = vadd.f32 %v193_v40, %v180_v35  ;;  %v848_v42 = vadd.f32 %v821_v39, %v808_v36  ;;  %v179_v43 = vadd.f32 %v1648_v28, %v167_v37  ;;  %v807_v44 = vadd.f32 %v799_v38, %v1648_v28  ;;  %v1344_v53 = vpop.f32.mrf.mxu0  ;;  %v1358_v3 = vpop.f32.mrf.mxu1 }
  0xcb   :  { %v170_v55 = vmul.f32 2.0, %v1344_v53  ;;  %v802_v9 = vmul.f32 2.0, %v1358_v3  ;;  %v1739_v36 = vrot.slane %v28_v20, %v1645_v25  ;;  %v2617_v53 = vmov 0 }
  0xcc   :  { %vm228_vm1 = vcmp.gt.f32.partialorder %v220_v41, 1e-16  ;;  %vm236_vm2 = vcmp.lt.f32.partialorder %v220_v41, 105.542725  ;;  %vm856_vm3 = vcmp.gt.f32.partialorder %v848_v42, 1e-16  ;;  %v219_v45 = vadd.f32 %v189_v27, %v179_v43  ;;  %v138_v30 = vpop.f32.mrf.mxu0 }
  0xcd   :  { %vm1654_vm4 = vmand %vm228_vm1, %vm236_vm2  ;;  %vm864_vm5 = vcmp.lt.f32.partialorder %v848_v42, 105.542725  ;;  %v847_v51 = vadd.f32 %v817_v26, %v807_v44  ;;  %v182_v58 = vadd.f32 %v1648_v28, %v170_v55  ;;  %v810_v18 = vadd.f32 %v802_v9, %v1648_v28 }
  0xce   :  { %v2603_v46 = vsel %vm1654_vm4, 4294967295, %v2602_v46  ;;  %v1660_v47 = vsel %vm1654_vm4, %v220_v41, 1.0  ;;  %vm1662_vm6 = vmand %vm856_vm3, %vm864_vm5  ;;  %vm227_vm7 = vcmp.gt.f32.partialorder %v219_v45, 1e-16  ;;  %vm235_vm8 = vcmp.lt.f32.partialorder %v219_v45, 105.542725 }
  0xcf   :  { %2604 = vst [vmem:[#allocation5_spill] sm:$0xff] %v2603_v46  ;;  %v2606_v48 = vsel %vm1662_vm6, 4294967295, %v2605_v48  ;;  %1369 = vrsqrt.f32 %v1660_v47  ;;  %v1669_v49 = vsel %vm1662_vm6, %v848_v42, 1.0  ;;  %vm1671_vm9 = vmand %vm227_vm7, %vm235_vm8  ;;  %vm855_vm10 = vcmp.gt.f32.partialorder %v847_v51, 1e-16 }
  0xd0   :  { %2607 = vst [vmem:[#allocation6_spill] sm:$0xff] %v2606_v48  ;;  %1371 = vrsqrt.f32 %v1669_v49  ;;  %v1678_v52 = vsel %vm1671_vm9, %v219_v45, 1.0  ;;  %vm863_vm11 = vcmp.lt.f32.partialorder %v847_v51, 105.542725  ;;  %v222_v0 = vadd.f32 %v201_v61, %v182_v58 }
  0xd1   :  { %1373 = vrsqrt.f32 %v1678_v52  ;;  %vm1681_vm12 = vmand %vm855_vm10, %vm863_vm11  ;;  %v850_v33 = vadd.f32 %v829_v24, %v810_v18  ;;  %v169_v38 = vmul.f32 2.0, %v138_v30  ;;  %v284_v43 = vmul.f32 0.17453292, %v1660_v47 }
  0xd2   :  { %v2611_v54 = vsel %vm1681_vm12, 4294967295, %v2610_v54  ;;  %v1689_v57 = vsel %vm1681_vm12, %v847_v51, 1.0  ;;  %vm230_vm13 = vcmp.gt.f32.partialorder %v222_v0, 1e-16  ;;  %vm238_vm14 = vcmp.lt.f32.partialorder %v222_v0, 105.542725 }
  0xd3   :  { %2612 = vst [vmem:[#allocation7_spill] sm:$0xff] %v2611_v54  ;;  %1375 = vrsqrt.f32 %v1689_v57  ;;  %vm1715_vm15 = vmand %vm230_vm13, %vm238_vm14  ;;  %vm858_vm0 = vcmp.gt.f32.partialorder %v850_v33, 1e-16  ;;  %vm866_vm1 = vcmp.lt.f32.partialorder %v850_v33, 105.542725  ;;  %v464_v25 = vmul.f32 %v1739_v36, %v1660_v47 }
  0xd4   :  { %v2615_v15 = vsel %vm1715_vm15, 4294967295, %v2614_v15  ;;  %v1727_v23 = vsel %vm1715_vm15, %v222_v0, 1.0  ;;  %v912_v45 = vmul.f32 0.17453292, %v1669_v49  ;;  %vm1759_vm2 = vmand %vm858_vm0, %vm866_vm1  ;;  %v1080_v55 = vmul.f32 %v1669_v49, %v1739_v36 }
  0xd5   :  { %2616 = vst [vmem:[#allocation9_spill] sm:$0xff] %v2615_v15  ;;  %1377 = vrsqrt.f32 %v1727_v23  ;;  %v2618_v53 = vsel %vm1759_vm2, 4294967295, %v2617_v53  ;;  %v181_v58 = vadd.f32 %v1648_v28, %v169_v38  ;;  %v283_v61 = vmul.f32 0.17453292, %v1678_v52 }
  0xd6   :  { %2619 = vst [vmem:[#allocation10_spill] sm:$0xff] %v2618_v53  ;;  %v1771_v0 = vsel %vm1759_vm2, %v850_v33, 1.0  ;;  %v1040_v1 = vsub.f32 0.0, %v912_v45  ;;  %v911_v24 = vmul.f32 0.17453292, %v1689_v57  ;;  %v1079_v33 = vmul.f32 %v1689_v57, %v1739_v36 }
  0xd7   :  { %v466_v45 = vmul.f32 %v1739_v36, %v1727_v23 }
  0xdc   :  { %v1693_v59 = vpop.eup %1369 }
  0xdd   :  { %v1695_v60 = vpop.eup %1371  ;;  %v268_v62 = vmul.f32 %v1693_v59, %v1660_v47  ;;  %v412_v47 = vsub.f32 0.0, %v284_v43 }
  0xde   :  { %v1699_v63 = vpop.eup %1373  ;;  %v896_v6 = vmul.f32 %v1695_v60, %v1669_v49  ;;  %v221_v49 = vadd.f32 %v1685_v56, %v181_v58 }
  0xdf   :  { %v267_v2 = vmul.f32 %v1699_v63, %v1678_v52  ;;  %v276_v4 = vmul.f32 0.41777137, %v268_v62  ;;  %v450_v12 = vmul.f32 %v1707_v5, %v268_v62  ;;  %v592_v62 = vsub.f32 0.0, %v464_v25 }
  0xe0   :  { %v904_v13 = vmul.f32 0.41777137, %v896_v6  ;;  %v1072_v16 = vmul.f32 %v896_v6, %v1707_v5  ;;  %v1721_v19 = vpop.eup %1375  ;;  %v421_v3 = vmul.f32 1.442695, %v412_v47  ;;  %v463_v6 = vmul.f32 %v1739_v36, %v1678_v52 }
  0xe1   :  { %v275_v7 = vmul.f32 0.41777137, %v267_v2  ;;  %v449_v8 = vmul.f32 %v1707_v5, %v267_v2  ;;  %v292_v11 = vmul.f32 0.3275911, %v276_v4  ;;  %v472_v22 = vmul.f32 0.3275911, %v450_v12  ;;  %v770_v12 = vpop.f32.mrf.mxu1 }
  0xe2   :  { %v920_v26 = vmul.f32 0.3275911, %v904_v13  ;;  %v895_v29 = vmul.f32 %v1721_v19, %v1689_v57  ;;  %v1088_v31 = vmul.f32 0.3275911, %v1072_v16  ;;  %v1208_v2 = vsub.f32 0.0, %v1080_v55 }
  0xe3   :  { %v291_v14 = vmul.f32 0.3275911, %v275_v7  ;;  %v471_v17 = vmul.f32 0.3275911, %v449_v8  ;;  %v1723_v21 = vadd.f32 1.0, %v292_v11  ;;  %v1741_v37 = vadd.f32 1.0, %v472_v22  ;;  %v1778_v7 = vpop.eup %1377 }
  0xe4   :  { %v903_v34 = vmul.f32 0.41777137, %v895_v29  ;;  %v1071_v35 = vmul.f32 %v895_v29, %v1707_v5  ;;  %v1743_v39 = vadd.f32 1.0, %v920_v26  ;;  %v1746_v42 = vadd.f32 1.0, %v1088_v31  ;;  %2620 = vst [vmem:[#allocation11_spill] sm:$0xff] %v1778_v7 }
  0xe5   :  { %v1729_v27 = vadd.f32 1.0, %v291_v14  ;;  %v1733_v32 = vadd.f32 1.0, %v471_v17  ;;  %1379 = vrcp.f32 %v1723_v21  ;;  %v411_v4 = vsub.f32 0.0, %v283_v61 }
  0xe6   :  { %v919_v40 = vmul.f32 0.3275911, %v903_v34  ;;  %v1087_v41 = vmul.f32 0.3275911, %v1071_v35  ;;  %v601_v8 = vmul.f32 1.442695, %v592_v62  ;;  %v270_v18 = vmul.f32 %v1778_v7, %v1727_v23 }
  0xe7   :  { %1381 = vrcp.f32 %v1729_v27  ;;  %v1049_v11 = vmul.f32 1.442695, %v1040_v1  ;;  %v1217_v14 = vmul.f32 1.442695, %v1208_v2  ;;  %vm229_vm3 = vcmp.gt.f32.partialorder %v221_v49, 1e-16 }
  0xe8   :  { %1383 = vrcp.f32 %v1733_v32  ;;  %v1750_v44 = vadd.f32 1.0, %v919_v40  ;;  %v1757_v51 = vadd.f32 1.0, %v1087_v41  ;;  %vm237_vm5 = vcmp.lt.f32.partialorder %v221_v49, 105.542725 }
  0xe9   :  { %1385 = vrcp.f32 %v1741_v37  ;;  %v419_v56 = vmul.f32 1.442695, %v411_v4  ;;  %v591_v17 = vsub.f32 0.0, %v463_v6  ;;  %v801_v52 = vmul.f32 2.0, %v770_v12  ;;  %vm1784_vm7 = vmand %vm229_vm3, %vm237_vm5 }
  0xea   :  { %1387 = vrcp.f32 %v1743_v39  ;;  %v2621_v26 = vmov 0  ;;  %v286_v41 = vmul.f32 0.17453292, %v1727_v23  ;;  %v1798_v43 = vsel %vm1784_vm7, %v221_v49, 1.0 }
  0xeb   :  { %1389 = vrcp.f32 %v1746_v42  ;;  %v2622_v26 = vsel %vm1784_vm7, 4294967295, %v2621_v26  ;;  %v1792_v35 = vmul.f32 1.442695, %v591_v17  ;;  %v1039_v57 = vsub.f32 0.0, %v911_v24 }
  0xec   :  { %1391 = vrcp.f32 %v1750_v44  ;;  %2623 = vst [vmem:[#allocation12_spill] sm:$0xff] %v2622_v26  ;;  %v1207_v61 = vsub.f32 0.0, %v1079_v33  ;;  %v914_v2 = vmul.f32 0.17453292, %v1771_v0  ;;  %v452_v4 = vmul.f32 %v1707_v5, %v270_v18 }
  0xed   :  { %1393 = vrcp.f32 %v1757_v51 }
  0xee   :  { %1395 = vrsqrt.f32 %v1771_v0 }
  0xef   :  { %1397 = vpow2.f32 %v421_v3  ;;  %v414_v3 = vsub.f32 0.0, %v286_v41 }
  0xf0   :  { %1399 = vpow2.f32 %v601_v8 }
  0xf1   :  { %1401 = vpow2.f32 %v1049_v11  ;;  %v594_v11 = vsub.f32 0.0, %v466_v45 }
  0xf2   :  { %v1380_v9 = vpop.eup %1379  ;;  %1403 = vpow2.f32 %v1217_v14 }
  0xf3   :  { %v316_v22 = vmul.f32 %v1380_v9, %v1723_v21  ;;  %1405 = vpow2.f32 %v419_v56  ;;  %v278_v21 = vmul.f32 0.41777137, %v270_v18  ;;  %v1821_v56 = vmul.f32 %v1771_v0, %v1739_v36 }
  0xf4   :  { %v1382_v13 = vpop.eup %1381  ;;  %1407 = vrsqrt.f32 %v1798_v43 }
  0xf5   :  { %v1384_v16 = vpop.eup %1383  ;;  %v315_v30 = vmul.f32 %v1382_v13, %v1729_v27  ;;  %v809_v27 = vadd.f32 %v801_v52, %v1648_v28  ;;  %v294_v1 = vmul.f32 0.3275911, %v278_v21  ;;  %v1047_v52 = vmul.f32 1.442695, %v1039_v57 }
  0xf6   :  { %v1386_v20 = vpop.eup %1385  ;;  %v495_v31 = vmul.f32 %v1384_v16, %v1733_v32  ;;  %v324_v32 = vsub.f32 2.0, %v316_v22  ;;  %v474_v22 = vmul.f32 0.3275911, %v452_v4 }
  0xf7   :  { %v1388_v29 = vpop.eup %1387  ;;  %v496_v40 = vmul.f32 %v1386_v20, %v1741_v37  ;;  %v323_v47 = vsub.f32 2.0, %v315_v30  ;;  %v849_v23 = vadd.f32 %v1712_v10, %v809_v27  ;;  %v1823_v18 = vadd.f32 1.0, %v294_v1  ;;  %v1347_v1 = vpop.f32.mrf.mxu0 }
  0xf8   :  { %v1390_v34 = vpop.eup %1389  ;;  %v944_v25 = vmul.f32 %v1388_v29, %v1743_v39  ;;  %v503_v37 = vsub.f32 2.0, %v495_v31  ;;  %v1812_v6 = vmul.f32 %v1380_v9, %v324_v32  ;;  %v425_v32 = vmul.f32 1.442695, %v414_v3 }
  0xf9   :  { %v1392_v38 = vpop.eup %1391  ;;  %v1112_v58 = vmul.f32 %v1390_v34, %v1746_v42  ;;  %v504_v39 = vsub.f32 2.0, %v496_v40  ;;  %v1815_v12 = vmul.f32 %v1382_v13, %v323_v47  ;;  %v1042_v13 = vsub.f32 0.0, %v914_v2 }
  0xfa   :  { %v1394_v55 = vpop.eup %1393  ;;  %v943_v62 = vmul.f32 %v1392_v38, %v1750_v44  ;;  %v952_v42 = vsub.f32 2.0, %v944_v25  ;;  %v1817_v14 = vmul.f32 %v1384_v16, %v503_v37  ;;  %vm857_vm8 = vcmp.gt.f32.partialorder %v849_v23, 1e-16 }
  0xfb   :  { %v1808_v49 = vpop.eup %1395  ;;  %v1111_v8 = vmul.f32 %v1394_v55, %v1757_v51  ;;  %v1120_v44 = vsub.f32 2.0, %v1112_v58  ;;  %v1829_v51 = vmul.f32 %v1386_v20, %v504_v39  ;;  %v340_v24 = vmul.f32 1.0614054, %v1812_v6 }
  0xfc   :  { %2624 = vst [vmem:[#allocation13_spill] sm:$0xff] %v1808_v49  ;;  %v951_v17 = vsub.f32 2.0, %v943_v62  ;;  %v898_v10 = vmul.f32 %v1808_v49, %v1771_v0  ;;  %v1827_v9 = vpop.eup %1397  ;;  %v1834_v30 = vmul.f32 %v1388_v29, %v952_v42  ;;  %vm865_vm10 = vcmp.lt.f32.partialorder %v849_v23, 105.542725 }
  0xfd   :  { %v1831_v16 = vpop.eup %1399  ;;  %v1119_v31 = vsub.f32 2.0, %v1111_v8  ;;  %v1838_v21 = vmul.f32 %v1390_v34, %v1120_v44  ;;  %v339_v0 = vmul.f32 1.0614054, %v1815_v12  ;;  %v519_v20 = vmul.f32 1.0614054, %v1817_v14  ;;  %vm1855_vm11 = vmand %vm857_vm8, %vm865_vm10 }
  0xfe   :  { %v1836_v33 = vpop.eup %1401  ;;  %v1215_v40 = vmul.f32 1.442695, %v1207_v61  ;;  %v1844_v27 = vmul.f32 %v1392_v38, %v951_v17  ;;  %1409 = vrcp.f32 %v1823_v18  ;;  %v906_v29 = vmul.f32 0.41777137, %v898_v10 }
  0xff   :  { %v1842_v41 = vpop.eup %1403  ;;  %v520_v57 = vmul.f32 1.0614054, %v1829_v51  ;;  %v1850_v45 = vadd.f32 1.0, %v474_v22  ;;  %v605_v34 = vmul.f32 1.442695, %v594_v11  ;;  %v1074_v58 = vmul.f32 %v898_v10, %v1707_v5  ;;  %v1872_v10 = vpop.permute.xlu0 %204 }
 0x100   :  { %v1847_v25 = vpop.eup %1405  ;;  %v2625_v47 = vmov 0  ;;  %v348_v38 = vadd.f32 -1.4531521, %v340_v24  ;;  %v968_v37 = vmul.f32 1.0614054, %v1834_v30  ;;  %v1860_v61 = vmul.f32 %v1394_v55, %v1119_v31 }
 0x101   :  { %v2626_v47 = vsel %vm1855_vm11, 4294967295, %v2625_v47  ;;  %v1053_v62 = vmul.f32 1.442695, %v1042_v13  ;;  %v1136_v2 = vmul.f32 1.0614054, %v1838_v21  ;;  %1411 = vpow2.f32 %v1792_v35  ;;  %v1869_v11 = vpop.eup %1407 }
 0x102   :  { %2627 = vst [vmem:[#allocation14_spill] sm:$0xff] %v2626_v47  ;;  %v347_v39 = vadd.f32 -1.4531521, %v339_v0  ;;  %v527_v3 = vadd.f32 -1.4531521, %v519_v20  ;;  %1413 = vpow2.f32 %v1047_v52  ;;  %v1867_v8 = vsel %vm1855_vm11, %v849_v23, 1.0 }
 0x103   :  { %v967_v4 = vmul.f32 1.0614054, %v1844_v27  ;;  %v922_v42 = vmul.f32 0.3275911, %v906_v29  ;;  %2628 = vst [vmem:[#allocation15_spill] sm:$0xff] %v1869_v11  ;;  %1415 = vrcp.f32 %v1850_v45  ;;  %v172_v17 = vmul.f32 2.0, %v1347_v1 }
 0x104   :  { %v528_v55 = vadd.f32 -1.4531521, %v520_v57  ;;  %v1090_v44 = vmul.f32 0.3275911, %v1074_v58  ;;  %v356_v22 = vmul.f32 %v348_v38, %v1812_v6  ;;  %v976_v35 = vadd.f32 -1.4531521, %v968_v37 }
 0x105   :  { %v1135_v13 = vmul.f32 1.0614054, %v1860_v61  ;;  %v1210_v52 = vsub.f32 0.0, %v1821_v56  ;;  %v1144_v24 = vadd.f32 -1.4531521, %v1136_v2  ;;  %v355_v23 = vmul.f32 %v347_v39, %v1815_v12  ;;  %v1361_v2 = vpop.f32.mrf.mxu1 }
 0x106   :  { %v535_v31 = vmul.f32 %v527_v3, %v1817_v14  ;;  %1417 = vrsqrt.f32 %v1867_v8  ;;  %v975_v0 = vadd.f32 -1.4531521, %v967_v4  ;;  %v1880_v20 = vadd.f32 1.0, %v922_v42  ;;  %v209_v4 = vpop.permute.xlu0 %208 }
 0x107   :  { %1419 = vpow2.f32 %v1215_v40  ;;  %v269_v29 = vmul.f32 %v1869_v11, %v1798_v43  ;;  %v536_v57 = vmul.f32 %v528_v55, %v1829_v51  ;;  %v1885_v58 = vadd.f32 1.0, %v1090_v44  ;;  %v148_v44 = vpop.f32.mrf.mxu0 }
 0x108   :  { %1421 = vpow2.f32 %v425_v32  ;;  %v184_v56 = vadd.f32 %v1648_v28, %v172_v17  ;;  %v364_v38 = vadd.f32 1.4214138, %v356_v22  ;;  %v984_v37 = vmul.f32 %v976_v35, %v1834_v30 }
 0x109   :  { %v1143_v1 = vadd.f32 -1.4531521, %v1135_v13  ;;  %1423 = vpow2.f32 %v605_v34  ;;  %v1152_v40 = vmul.f32 %v1144_v24, %v1838_v21  ;;  %v363_v39 = vadd.f32 1.4214138, %v355_v23  ;;  %v1895_v13 = vpop.permute.xlu1 %832 }
 0x10a   :  { %v543_v3 = vadd.f32 1.4214138, %v535_v31  ;;  %1425 = vpow2.f32 %v1053_v62  ;;  %v983_v42 = vmul.f32 %v975_v0, %v1844_v27  ;;  %v1892_v32 = vmul.f32 1.442695, %v1210_v52 }
 0x10b   :  { %1427 = vrcp.f32 %v1880_v20  ;;  %v277_v55 = vmul.f32 0.41777137, %v269_v29  ;;  %v1410_v17 = vpop.eup %1409  ;;  %v544_v22 = vadd.f32 1.4214138, %v536_v57  ;;  %v224_v34 = vadd.f32 %v209_v4, %v184_v56 }
 0x10c   :  { %1429 = vrcp.f32 %v1885_v58  ;;  %v804_v35 = vmul.f32 2.0, %v1361_v2  ;;  %v372_v24 = vmul.f32 %v364_v38, %v1812_v6  ;;  %v992_v62 = vadd.f32 1.4214138, %v984_v37  ;;  %v780_v37 = vpop.f32.mrf.mxu1 }
 0x10d   :  { %v1151_v23 = vmul.f32 %v1143_v1, %v1860_v61  ;;  %v451_v31 = vmul.f32 %v1707_v5, %v269_v29  ;;  %v1160_v0 = vadd.f32 1.4214138, %v1152_v40  ;;  %v371_v52 = vmul.f32 %v363_v39, %v1815_v12  ;;  %v837_v7 = vpop.permute.xlu1 %836 }
 0x10e   :  { %v551_v53 = vmul.f32 %v543_v3, %v1817_v14  ;;  %v1902_v49 = vmul.f32 2.0, %v148_v44  ;;  %v1904_v57 = vpop.eup %1411  ;;  %v991_v56 = vadd.f32 1.4214138, %v983_v42  ;;  %v318_v2 = vmul.f32 %v1410_v17, %v1823_v18 }
 0x10f   :  { %v1908_v4 = vmul.f32 0.17453292, %v1798_v43  ;;  %v293_v38 = vmul.f32 0.3275911, %v277_v55  ;;  %v1910_v1 = vpop.eup %1413  ;;  %v552_v29 = vmul.f32 %v544_v22, %v1829_v51  ;;  %vm232_vm13 = vcmp.gt.f32.partialorder %v224_v34, 1e-16 }
 0x110   :  { %vm240_vm14 = vcmp.lt.f32.partialorder %v224_v34, 105.542725  ;;  %v812_v40 = vadd.f32 %v804_v35, %v1648_v28  ;;  %v1416_v39 = vpop.eup %1415  ;;  %v380_v3 = vadd.f32 -0.28449672, %v372_v24  ;;  %v1000_v44 = vmul.f32 %v992_v62, %v1834_v30 }
 0x111   :  { %v1159_v42 = vadd.f32 1.4214138, %v1151_v23  ;;  %v473_v47 = vmul.f32 0.3275911, %v451_v31  ;;  %v1168_v18 = vmul.f32 %v1160_v0, %v1838_v21  ;;  %v379_v26 = vadd.f32 -0.28449672, %v371_v52  ;;  %vm1933_vm0 = vmand %vm232_vm13, %vm240_vm14 }
 0x112   :  { %v559_v15 = vadd.f32 -0.28449672, %v551_v53  ;;  %v1916_v55 = vmul.f32 2.0, %v780_v37  ;;  %v999_v22 = vmul.f32 %v991_v56, %v1844_v27  ;;  %v326_v54 = vsub.f32 2.0, %v318_v2 }
 0x113   :  { %v1918_v11 = vpop.eup %1417  ;;  %v1921_v48 = vadd.f32 1.0, %v293_v38  ;;  %v1925_v35 = vmul.f32 %v1739_v36, %v1798_v43  ;;  %v560_v62 = vadd.f32 -0.28449672, %v552_v29  ;;  %v498_v23 = vmul.f32 %v1416_v39, %v1850_v45 }
 0x114   :  { %2629 = vst [vmem:[#allocation16_spill] sm:$0xff] %v1918_v11  ;;  %v1927_v24 = vpop.eup %1419  ;;  %v2630_v31 = vmov 0  ;;  %v852_v0 = vadd.f32 %v837_v7, %v812_v40  ;;  %v388_v56 = vmul.f32 %v380_v3, %v1812_v6  ;;  %v1008_v43 = vadd.f32 -0.28449672, %v1000_v44 }
 0x115   :  { %v2631_v31 = vsel %vm1933_vm0, 4294967295, %v2630_v31  ;;  %v1937_v52 = vpop.eup %1421  ;;  %v1167_v2 = vmul.f32 %v1159_v42, %v1860_v61  ;;  %v1941_v38 = vadd.f32 1.0, %v473_v47  ;;  %v1176_v45 = vadd.f32 -0.28449672, %v1168_v18 }
 0x116   :  { %2632 = vst [vmem:[#allocation17_spill] sm:$0xff] %v2631_v31  ;;  %2633 = vst [vmem:[#allocation18_spill] sm:$0xff] %v1937_v52  ;;  %v1943_v37 = vpop.eup %1423  ;;  %v387_v29 = vmul.f32 %v379_v26, %v1815_v12  ;;  %v567_v53 = vmul.f32 %v559_v15, %v1817_v14  ;;  %v897_v46 = vmul.f32 %v1918_v11, %v1867_v8  ;;  %v1007_v40 = vadd.f32 -0.28449672, %v999_v22 }
 0x117   :  { %2634 = vst [vmem:[#allocation19_spill] sm:$0xff] %v1943_v37  ;;  %v1949_v7 = vpop.eup %1425  ;;  %v1951_v52 = vmul.f32 %v1410_v17, %v326_v54  ;;  %1431 = vrcp.f32 %v1921_v48  ;;  %v1956_v47 = vsel %vm1933_vm0, %v224_v34, 1.0  ;;  %v568_v44 = vmul.f32 %v560_v62, %v1829_v51 }
 0x118   :  { %2635 = vst [vmem:[#allocation20_spill] sm:$0xff] %v1949_v7  ;;  %v1428_v3 = vpop.eup %1427  ;;  %v506_v26 = vsub.f32 2.0, %v498_v23  ;;  %vm860_vm1 = vcmp.gt.f32.partialorder %v852_v0, 1e-16  ;;  %v396_v18 = vadd.f32 0.2548296, %v388_v56  ;;  %v1016_v11 = vmul.f32 %v1008_v43, %v1834_v30 }
 0x119   :  { %v1430_v42 = vpop.eup %1429  ;;  %v1175_v22 = vadd.f32 -0.28449672, %v1167_v2  ;;  %1433 = vrcp.f32 %v1941_v38  ;;  %v1184_v54 = vmul.f32 %v1176_v45, %v1838_v21  ;;  %v395_v17 = vadd.f32 0.2548296, %v387_v29 }
 0x11a   :  { %v905_v31 = vmul.f32 0.41777137, %v897_v46  ;;  %1435 = vrsqrt.f32 %v1956_v47  ;;  %v575_v34 = vadd.f32 0.2548296, %v567_v53  ;;  %v1015_v62 = vmul.f32 %v1007_v40, %v1844_v27 }
 0x11b   :  { %v342_v23 = vmul.f32 1.0614054, %v1951_v52  ;;  %v946_v15 = vmul.f32 %v1428_v3, %v1880_v20  ;;  %v1967_v7 = vmul.f32 %v1416_v39, %v506_v26  ;;  %v1073_v56 = vmul.f32 %v897_v46, %v1707_v5 }
 0x11c   :  { %vm868_vm3 = vcmp.lt.f32.partialorder %v852_v0, 105.542725  ;;  %v183_v43 = vadd.f32 %v1648_v28, %v1902_v49  ;;  %v576_v2 = vadd.f32 0.2548296, %v568_v44  ;;  %v1024_v45 = vadd.f32 0.2548296, %v1016_v11 }
 0x11d   :  { %v1183_v29 = vmul.f32 %v1175_v22, %v1860_v61  ;;  %v1114_v53 = vmul.f32 %v1430_v42, %v1885_v58  ;;  %v404_v40 = vmul.f32 %v396_v18, %v1812_v6  ;;  %v1192_v37 = vadd.f32 0.2548296, %v1184_v54  ;;  %vm1979_vm5 = vmand %vm860_vm1, %vm868_vm3 }
 0x11e   :  { %1437 = vpow2.f32 %v1892_v32  ;;  %v921_v20 = vmul.f32 0.3275911, %v905_v31  ;;  %v403_v39 = vmul.f32 %v395_v17, %v1815_v12  ;;  %v583_v46 = vmul.f32 %v575_v34, %v1817_v14 }
 0x11f   :  { %v350_v26 = vadd.f32 -1.4531521, %v342_v23  ;;  %v954_v5 = vsub.f32 2.0, %v946_v15  ;;  %v2636_v49 = vmov 0  ;;  %v1023_v11 = vadd.f32 0.2548296, %v1015_v62 }
 0x120   :  { %v2637_v49 = vsel %vm1979_vm5, 4294967295, %v2636_v49  ;;  %v522_v58 = vmul.f32 1.0614054, %v1967_v7  ;;  %v1089_v44 = vmul.f32 0.3275911, %v1073_v56  ;;  %v223_v6 = vadd.f32 %v1872_v10, %v183_v43 }
 0x121   :  { %2638 = vst [vmem:[#allocation21_spill] sm:$0xff] %v2637_v49  ;;  %v584_v32 = vmul.f32 %v576_v2, %v1829_v51  ;;  %v1032_v31 = vmul.f32 %v1024_v45, %v1834_v30  ;;  %v1191_v12 = vadd.f32 0.2548296, %v1183_v29  ;;  %v1122_v18 = vsub.f32 2.0, %v1114_v53 }
 0x122   :  { %v1987_v14 = vadd.f32 1.0, %v921_v20  ;;  %v1991_v15 = vsel %vm1979_vm5, %v852_v0, 1.0  ;;  %vm231_vm8 = vcmp.gt.f32.partialorder %v223_v6, 1e-16  ;;  %vm239_vm10 = vcmp.lt.f32.partialorder %v223_v6, 105.542725 }
 0x123   :  { %v1200_v22 = vmul.f32 %v1192_v37, %v1838_v21  ;;  %v435_v54 = vmul.f32 %v1847_v25, %v403_v39  ;;  %v358_v10 = vmul.f32 %v350_v26, %v1951_v52  ;;  %v1996_v17 = vmul.f32 %v1428_v3, %v954_v5  ;;  %vm1998_vm13 = vmand %vm231_vm8, %vm239_vm10 }
 0x124   :  { %v1432_v30 = vpop.eup %1431  ;;  %v615_v34 = vmul.f32 %v1904_v57, %v583_v46  ;;  %v1031_v0 = vmul.f32 %v1023_v11, %v1844_v27  ;;  %v530_v62 = vadd.f32 -1.4531521, %v522_v58  ;;  %v2004_v23 = vadd.f32 1.0, %v1089_v44 }
 0x125   :  { %v1199_v21 = vmul.f32 %v1191_v12, %v1860_v61  ;;  %v2007_v37 = vmul.f32 %v1430_v42, %v1122_v18  ;;  %1439 = vrsqrt.f32 %v1991_v15  ;;  %v2012_v5 = vsel %vm1998_vm13, %v223_v6, 1.0 }
 0x126   :  { %v1434_v25 = vpop.eup %1433  ;;  %v436_v3 = vmul.f32 %v1827_v9, %v404_v40  ;;  %v616_v57 = vmul.f32 %v1831_v16, %v584_v32  ;;  %v2641_v27 = vsub.f32 0.0, %v1908_v4  ;;  %1441 = vrcp.f32 %v1987_v14 }
 0x127   :  { %v2019_v43 = vpop.eup %1435  ;;  %v366_v61 = vadd.f32 1.4214138, %v358_v10  ;;  %v970_v42 = vmul.f32 1.0614054, %v1996_v17  ;;  %v317_v2 = vmul.f32 %v1432_v30, %v1921_v48  ;;  %1443 = vrsqrt.f32 %v2012_v5 }
 0x128   :  { %v423_v56 = vmul.f32 1.442695, %v2641_v27  ;;  %v1064_v45 = vmul.f32 %v1836_v33, %v1032_v31  ;;  %v1232_v9 = vmul.f32 %v1842_v41, %v1200_v22  ;;  %v538_v16 = vmul.f32 %v530_v62, %v1967_v7 }
 0x129   :  { %1445 = vrcp.f32 %v2004_v23  ;;  %v623_v4 = vsub.f32 %v435_v54, %v615_v34  ;;  %v1063_v29 = vmul.f32 %v1910_v1, %v1031_v0  ;;  %v1231_v53 = vmul.f32 %v1927_v24, %v1199_v21 }
 0x12a   :  { %v1138_v40 = vmul.f32 1.0614054, %v2007_v37  ;;  %v497_v20 = vmul.f32 %v1434_v25, %v1941_v38  ;;  %v2642_v48 = vsub.f32 0.0, %v1925_v35  ;;  %v272_v33 = vmul.f32 %v2019_v43, %v1956_v47 }
 0x12b   :  { %v811_v41 = vadd.f32 %v1916_v55, %v1648_v28  ;;  %v2038_v46 = vpop.eup %1437  ;;  %v624_v26 = vsub.f32 %v436_v3, %v616_v57  ;;  %v374_v1 = vmul.f32 %v366_v61, %v1951_v52  ;;  %v978_v11 = vadd.f32 -1.4531521, %v970_v42 }
 0x12c   :  { %v603_v39 = vmul.f32 1.442695, %v2642_v48  ;;  %v325_v24 = vsub.f32 2.0, %v317_v2  ;;  %v1240_v58 = vsub.f32 %v1064_v45, %v1232_v9  ;;  %v546_v44 = vadd.f32 1.4214138, %v538_v16  ;;  %v1350_v45 = vpop.f32.mrf.mxu0 }
 0x12d   :  { %v913_v38 = vmul.f32 0.17453292, %v1867_v8  ;;  %v1081_v35 = vmul.f32 %v1867_v8, %v1739_v36  ;;  %v631_v6 = vmul.f32 %v1699_v63, %v623_v4  ;;  %v1239_v32 = vsub.f32 %v1063_v29, %v1231_v53 }
 0x12e   :  { %v1146_v31 = vadd.f32 -1.4531521, %v1138_v40  ;;  %1447 = vpow2.f32 %v423_v56  ;;  %v505_v55 = vsub.f32 2.0, %v497_v20  ;;  %v280_v12 = vmul.f32 0.41777137, %v272_v33  ;;  %v2078_v20 = vpop.permute.xlu0 %212 }
 0x12f   :  { %1449 = vpow2.f32 %v603_v39  ;;  %v851_v18 = vadd.f32 %v1895_v13, %v811_v41  ;;  %v632_v22 = vmul.f32 %v1693_v59, %v624_v26  ;;  %v382_v54 = vadd.f32 -0.28449672, %v374_v1  ;;  %v2643_v13 = vld [vmem:[#allocation8_spill] sm:$0xff] }
 0x130   :  { %v986_v10 = vmul.f32 %v978_v11, %v1996_v17  ;;  %v2048_v34 = vmul.f32 %v1432_v30, %v325_v24  ;;  %v2051_v0 = vmul.f32 %v1695_v60, %v1240_v58  ;;  %v554_v63 = vmul.f32 %v546_v44, %v1967_v7 }
 0x131   :  { %v1041_v8 = vsub.f32 0.0, %v913_v38  ;;  %v1209_v62 = vsub.f32 0.0, %v1081_v35  ;;  %v639_v21 = vsel %vm1671_vm9, %v631_v6, 0.0  ;;  %v2057_v3 = vmul.f32 %v1721_v19, %v1239_v32 }
 0x132   :  { %v1154_v59 = vmul.f32 %v1146_v31, %v2007_v37  ;;  %v454_v57 = vmul.f32 %v2643_v13, %v272_v33  ;;  %v2061_v27 = vpop.eup %1439  ;;  %v2063_v30 = vmul.f32 %v1434_v25, %v505_v55  ;;  %v296_v60 = vmul.f32 0.3275911, %v280_v12 }
 0x133   :  { %2644 = vst [vmem:[#allocation8_spill] sm:$0xff] %v2061_v27  ;;  %vm859_vm14 = vcmp.gt.f32.partialorder %v851_v18, 1e-16  ;;  %vm867_vm1 = vcmp.lt.f32.partialorder %v851_v18, 105.542725  ;;  %v1442_v56 = vpop.eup %1441  ;;  %v640_v42 = vsel %vm1654_vm4, %v632_v22, 0.0  ;;  %v390_v50 = vmul.f32 %v382_v54, %v1951_v52 }
 0x134   :  { %v994_v2 = vadd.f32 1.4214138, %v986_v10  ;;  %v341_v19 = vmul.f32 1.0614054, %v2048_v34  ;;  %v2069_v9 = vpop.eup %1443  ;;  %v2074_v4 = vadd.f32 %v640_v42, %v639_v21  ;;  %v562_v29 = vadd.f32 -0.28449672, %v554_v63  ;;  %vm2086_vm4 = vmand %vm859_vm14, %vm867_vm1 }
 0x135   :  { %v2076_v53 = vmul.f32 1.442695, %v1041_v8  ;;  %v1162_v48 = vadd.f32 1.4214138, %v1154_v59  ;;  %v476_v39 = vmul.f32 0.3275911, %v454_v57  ;;  %v900_v33 = vmul.f32 %v2061_v27, %v1991_v15 }
 0x136   :  { %v1446_v40 = vpop.eup %1445  ;;  %v271_v41 = vmul.f32 %v2069_v9, %v2012_v5  ;;  %v2647_v26 = vmov 0  ;;  %v521_v24 = vmul.f32 1.0614054, %v2063_v30  ;;  %v2094_v58 = vadd.f32 1.0, %v296_v60 }
 0x137   :  { %v2648_v26 = vsel %vm2086_vm4, 4294967295, %v2647_v26  ;;  %v174_v44 = vmul.f32 2.0, %v1350_v45  ;;  %v398_v38 = vadd.f32 0.2548296, %v390_v50  ;;  %v1002_v35 = vmul.f32 %v994_v2, %v1996_v17 }
 0x138   :  { %2649 = vst [vmem:[#allocation5_spill] sm:$0xff] %v2648_v26  ;;  %v349_v6 = vadd.f32 -1.4531521, %v341_v19  ;;  %v2097_v32 = vmul.f32 1.442695, %v1209_v62  ;;  %v945_v31 = vmul.f32 %v1442_v56, %v1987_v14  ;;  %v1113_v55 = vmul.f32 %v1446_v40, %v2004_v23 }
 0x139   :  { %v279_v12 = vmul.f32 0.41777137, %v271_v41  ;;  %v2103_v22 = vsel %vm2086_vm4, %v851_v18, 1.0  ;;  %v570_v54 = vmul.f32 %v562_v29, %v1967_v7  ;;  %v1170_v10 = vmul.f32 %v1162_v48, %v2007_v37  ;;  %v217_v18 = vpop.permute.xlu0 %216 }
 0x13a   :  { %v2107_v63 = vadd.f32 1.0, %v476_v39  ;;  %v908_v8 = vmul.f32 0.41777137, %v900_v33  ;;  %v529_v62 = vadd.f32 -1.4531521, %v521_v24  ;;  %1451 = vrcp.f32 %v2094_v58 }
 0x13b   :  { %v2109_v21 = vpop.eup %1447  ;;  %v1076_v14 = vmul.f32 %v900_v33, %v2643_v13  ;;  %v186_v23 = vadd.f32 %v1648_v28, %v174_v44  ;;  %v1010_v57 = vadd.f32 -0.28449672, %v1002_v35  ;;  %v357_v60 = vmul.f32 %v349_v6, %v2048_v34 }
 0x13c   :  { %v2114_v59 = vpop.eup %1449  ;;  %v453_v61 = vmul.f32 %v2643_v13, %v271_v41  ;;  %1453 = vrsqrt.f32 %v2103_v22  ;;  %v953_v42 = vsub.f32 2.0, %v945_v31  ;;  %v1121_v50 = vsub.f32 2.0, %v1113_v55 }
 0x13d   :  { %v295_v2 = vmul.f32 0.3275911, %v279_v12  ;;  %v226_v19 = vadd.f32 %v217_v18, %v186_v23  ;;  %v578_v45 = vadd.f32 0.2548296, %v570_v54  ;;  %v288_v29 = vmul.f32 0.17453292, %v1956_v47 }
 0x13e   :  { %1455 = vrcp.f32 %v2107_v63  ;;  %v924_v48 = vmul.f32 0.3275911, %v908_v8  ;;  %v406_v39 = vmul.f32 %v398_v38, %v1951_v52  ;;  %v1178_v33 = vadd.f32 -0.28449672, %v1170_v10 }
 0x13f   :  { %v537_v24 = vmul.f32 %v529_v62, %v2063_v30  ;;  %v1092_v44 = vmul.f32 0.3275911, %v1076_v14  ;;  %v468_v41 = vmul.f32 %v1739_v36, %v1956_v47  ;;  %v475_v35 = vmul.f32 0.3275911, %v453_v61  ;;  %v1364_v62 = vpop.f32.mrf.mxu1  ;;  %v2654_v14 = vld [vmem:[#allocation18_spill] sm:$0xff] }
 0x140   :  { %vm234_vm9 = vcmp.gt.f32.partialorder %v226_v19, 1e-16  ;;  %vm242_vm3 = vcmp.lt.f32.partialorder %v226_v19, 105.542725  ;;  %v365_v6 = vadd.f32 1.4214138, %v357_v60  ;;  %v2125_v31 = vmul.f32 %v1442_v56, %v953_v42 }
 0x141   :  { %v2127_v55 = vmul.f32 %v1446_v40, %v1121_v50  ;;  %v2129_v12 = vadd.f32 1.0, %v295_v2  ;;  %vm2131_vm8 = vmand %vm234_vm9, %vm242_vm3  ;;  %v2651_v54 = vmov 0  ;;  %v586_v52 = vmul.f32 %v578_v45, %v1967_v7  ;;  %v2156_v45 = vpop.permute.xlu1 %840 }
 0x142   :  { %v2652_v54 = vsel %vm2131_vm8, 4294967295, %v2651_v54  ;;  %v1018_v38 = vmul.f32 %v1010_v57, %v1996_v17  ;;  %v2137_v10 = vadd.f32 1.0, %v924_v48  ;;  %v2141_v47 = vsel %vm2131_vm8, %v226_v19, 1.0 }
 0x143   :  { %2653 = vst [vmem:[#allocation6_spill] sm:$0xff] %v2652_v54  ;;  %v1186_v56 = vmul.f32 %v1178_v33, %v2007_v37  ;;  %v545_v40 = vadd.f32 1.4214138, %v537_v24  ;;  %v2144_v8 = vadd.f32 1.0, %v1092_v44  ;;  %1457 = vrsqrt.f32 %v2141_v47 }
 0x144   :  { %v438_v23 = vmul.f32 %v2654_v14, %v406_v39  ;;  %v416_v18 = vsub.f32 0.0, %v288_v29  ;;  %v916_v7 = vmul.f32 0.17453292, %v1991_v15  ;;  %v2149_v57 = vadd.f32 1.0, %v475_v35  ;;  %v2655_v29 = vld [vmem:[#allocation19_spill] sm:$0xff] }
 0x145   :  { %v373_v60 = vmul.f32 %v365_v6, %v2048_v34  ;;  %v969_v61 = vmul.f32 1.0614054, %v2125_v31  ;;  %v1137_v42 = vmul.f32 1.0614054, %v2127_v55  ;;  %1459 = vrcp.f32 %v2129_v12 }
 0x146   :  { %v1026_v50 = vadd.f32 0.2548296, %v1018_v38  ;;  %v596_v2 = vsub.f32 0.0, %v468_v41  ;;  %1461 = vrcp.f32 %v2137_v10  ;;  %v806_v19 = vmul.f32 2.0, %v1364_v62 }
 0x147   :  { %v618_v48 = vmul.f32 %v2655_v29, %v586_v52  ;;  %v1194_v39 = vadd.f32 0.2548296, %v1186_v56  ;;  %v553_v33 = vmul.f32 %v545_v40, %v2063_v30  ;;  %1463 = vrcp.f32 %v2144_v8  ;;  %v1452_v24 = vpop.eup %1451 }
 0x148   :  { %v429_v44 = vmul.f32 1.442695, %v416_v18  ;;  %v1044_v35 = vsub.f32 0.0, %v916_v7  ;;  %v1084_v6 = vmul.f32 %v1991_v15, %v1739_v36  ;;  %1465 = vrcp.f32 %v2149_v57 }
 0x149   :  { %v2164_v41 = vpop.eup %1453  ;;  %v381_v38 = vadd.f32 -0.28449672, %v373_v60  ;;  %v977_v62 = vadd.f32 -1.4531521, %v969_v61  ;;  %1467 = vpow2.f32 %v2076_v53  ;;  %v1145_v52 = vadd.f32 -1.4531521, %v1137_v42 }
 0x14a   :  { %2656 = vst [vmem:[#allocation7_spill] sm:$0xff] %v2164_v41  ;;  %v1034_v56 = vmul.f32 %v1026_v50, %v1996_v17  ;;  %1469 = vpow2.f32 %v2097_v32  ;;  %v609_v40 = vmul.f32 1.442695, %v596_v2  ;;  %v814_v14 = vadd.f32 %v806_v19, %v1648_v28  ;;  %v845_v17 = vpop.permute.xlu1 %844  ;;  %v2658_v19 = vld [vmem:[#allocation11_spill] sm:$0xff] }
 0x14b   :  { %v1456_v18 = vpop.eup %1455  ;;  %v626_v7 = vsub.f32 %v438_v23, %v618_v48  ;;  %v1202_v15 = vmul.f32 %v1194_v39, %v2007_v37  ;;  %v561_v29 = vadd.f32 -0.28449672, %v553_v33  ;;  %v320_v25 = vmul.f32 %v1452_v24, %v2094_v58  ;;  %v2657_v23 = vld [vmem:[#allocation20_spill] sm:$0xff] }
 0x14c   :  { %v1057_v11 = vmul.f32 1.442695, %v1044_v35  ;;  %v1212_v60 = vsub.f32 0.0, %v1084_v6  ;;  %v287_v61 = vmul.f32 0.17453292, %v2012_v5  ;;  %v899_v53 = vmul.f32 %v2164_v41, %v2103_v22 }
 0x14d   :  { %v389_v32 = vmul.f32 %v381_v38, %v2048_v34  ;;  %v985_v42 = vmul.f32 %v977_v62, %v2125_v31  ;;  %v1153_v50 = vmul.f32 %v1145_v52, %v2127_v55  ;;  %1471 = vpow2.f32 %v429_v44 }
 0x14e   :  { %v2179_v37 = vmul.f32 %v2657_v23, %v1034_v56  ;;  %v500_v58 = vmul.f32 %v1456_v18, %v2107_v63  ;;  %1473 = vpow2.f32 %v609_v40  ;;  %v854_v2 = vadd.f32 %v845_v17, %v814_v14 }
 0x14f   :  { %v2183_v48 = vmul.f32 %v2658_v19, %v626_v7  ;;  %v2186_v39 = vmul.f32 %v2038_v46, %v1202_v15  ;;  %v569_v33 = vmul.f32 %v561_v29, %v2063_v30  ;;  %v328_v35 = vsub.f32 2.0, %v320_v25 }
 0x150   :  { %v2189_v6 = vpop.eup %1457  ;;  %1475 = vpow2.f32 %v1057_v11  ;;  %v1225_v44 = vmul.f32 1.442695, %v1212_v60  ;;  %v415_v38 = vsub.f32 0.0, %v287_v61  ;;  %v907_v62 = vmul.f32 0.41777137, %v899_v53 }
 0x151   :  { %2659 = vst [vmem:[#allocation18_spill] sm:$0xff] %v2189_v6  ;;  %v397_v52 = vadd.f32 0.2548296, %v389_v32  ;;  %v993_v56 = vadd.f32 1.4214138, %v985_v42  ;;  %v274_v40 = vmul.f32 %v2189_v6, %v2141_v47  ;;  %v508_v7 = vsub.f32 2.0, %v500_v58 }
 0x152   :  { %v1161_v63 = vadd.f32 1.4214138, %v1153_v50  ;;  %v1460_v14 = vpop.eup %1459  ;;  %v2195_v46 = vmul.f32 %v1739_v36, %v2012_v5  ;;  %vm862_vm10 = vcmp.gt.f32.partialorder %v854_v2, 1e-16  ;;  %vm870_vm14 = vcmp.lt.f32.partialorder %v854_v2, 105.542725 }
 0x153   :  { %v1462_v25 = vpop.eup %1461  ;;  %v577_v15 = vadd.f32 0.2548296, %v569_v33  ;;  %v2197_v11 = vmul.f32 %v1452_v24, %v328_v35  ;;  %v1075_v29 = vmul.f32 %v899_v53, %v2643_v13  ;;  %v282_v60 = vmul.f32 0.41777137, %v274_v40  ;;  %vm2208_vm1 = vmand %vm862_vm10, %vm870_vm14 }
 0x154   :  { %v1464_v61 = vpop.eup %1463  ;;  %1477 = vpow2.f32 %v1225_v44  ;;  %v2200_v17 = vmul.f32 1.442695, %v415_v38  ;;  %v923_v32 = vmul.f32 0.3275911, %v907_v62  ;;  %v456_v42 = vmul.f32 %v2643_v13, %v274_v40  ;;  %v158_v38 = vpop.f32.mrf.mxu0 }
 0x155   :  { %v1466_v50 = vpop.eup %1465  ;;  %v405_v5 = vmul.f32 %v397_v52, %v2048_v34  ;;  %v1001_v23 = vmul.f32 %v993_v56, %v2125_v31  ;;  %v319_v58 = vmul.f32 %v1460_v14, %v2129_v12  ;;  %v298_v19 = vmul.f32 0.3275911, %v282_v60 }
 0x156   :  { %v2660_v24 = vmov 0  ;;  %v2212_v53 = vpop.eup %1467  ;;  %v1169_v33 = vmul.f32 %v1161_v63, %v2127_v55  ;;  %v2215_v35 = vmul.f32 %v1456_v18, %v508_v7  ;;  %v595_v44 = vsub.f32 0.0, %v2195_v46 }
 0x157   :  { %v2661_v24 = vsel %vm2208_vm1, 4294967295, %v2660_v24  ;;  %v478_v34 = vmul.f32 0.3275911, %v456_v42  ;;  %v2218_v62 = vpop.eup %1469  ;;  %v585_v12 = vmul.f32 %v577_v15, %v2063_v30  ;;  %v344_v52 = vmul.f32 1.0614054, %v2197_v11 }
 0x158   :  { %2662 = vst [vmem:[#allocation19_spill] sm:$0xff] %v2661_v24  ;;  %v948_v56 = vmul.f32 %v1462_v25, %v2137_v10  ;;  %v1091_v40 = vmul.f32 0.3275911, %v1075_v29  ;;  %v1116_v60 = vmul.f32 %v1464_v61, %v2144_v8  ;;  %v499_v49 = vmul.f32 %v1466_v50, %v2149_v57 }
 0x159   :  { %v2225_v63 = vadd.f32 1.0, %v923_v32  ;;  %v2229_v18 = vsel %vm2208_vm1, %v854_v2, 1.0  ;;  %v1009_v7 = vadd.f32 -0.28449672, %v1001_v23  ;;  %v327_v46 = vsub.f32 2.0, %v319_v58 }
 0x15a   :  { %v2231_v42 = vadd.f32 1.0, %v298_v19  ;;  %v173_v30 = vmul.f32 2.0, %v158_v38  ;;  %v2233_v15 = vpop.eup %1471  ;;  %v437_v10 = vmul.f32 %v2109_v21, %v405_v5  ;;  %v1177_v29 = vadd.f32 -0.28449672, %v1169_v33 }
 0x15b   :  { %v524_v8 = vmul.f32 1.0614054, %v2215_v35  ;;  %v2237_v27 = vadd.f32 1.0, %v478_v34  ;;  %v2239_v57 = vpop.eup %1473  ;;  %v617_v32 = vmul.f32 %v2114_v59, %v585_v12  ;;  %v956_v2 = vsub.f32 2.0, %v948_v56  ;;  %v790_v34 = vpop.f32.mrf.mxu1 }
 0x15c   :  { %v2242_v24 = vadd.f32 1.0, %v1091_v40  ;;  %1479 = vrsqrt.f32 %v2229_v18  ;;  %v352_v23 = vadd.f32 -1.4531521, %v344_v52  ;;  %v1124_v58 = vsub.f32 2.0, %v1116_v60 }
 0x15d   :  { %v507_v19 = vsub.f32 2.0, %v499_v49  ;;  %1481 = vrcp.f32 %v2225_v63  ;;  %v2246_v21 = vpop.eup %1475  ;;  %v1017_v5 = vmul.f32 %v1009_v7, %v2125_v31  ;;  %v2249_v33 = vmul.f32 %v1460_v14, %v327_v46 }
 0x15e   :  { %1483 = vrcp.f32 %v2231_v42  ;;  %v185_v59 = vadd.f32 %v1648_v28, %v173_v30  ;;  %v1185_v38 = vmul.f32 %v1177_v29, %v2127_v55  ;;  %v532_v12 = vadd.f32 -1.4531521, %v524_v8 }
 0x15f   :  { %v915_v52 = vmul.f32 0.17453292, %v2103_v22  ;;  %1485 = vrcp.f32 %v2237_v27  ;;  %v625_v49 = vsub.f32 %v437_v10, %v617_v32  ;;  %v2256_v56 = vmul.f32 %v1462_v25, %v956_v2 }
 0x160   :  { %1487 = vrcp.f32 %v2242_v24  ;;  %v225_v14 = vadd.f32 %v2078_v20, %v185_v59  ;;  %v360_v40 = vmul.f32 %v352_v23, %v2197_v11  ;;  %v2261_v60 = vmul.f32 %v1464_v61, %v1124_v58 }
 0x161   :  { %v2263_v7 = vmul.f32 %v1466_v50, %v507_v19  ;;  %v805_v46 = vmul.f32 2.0, %v790_v34  ;;  %v2265_v30 = vpop.eup %1477  ;;  %v343_v29 = vmul.f32 1.0614054, %v2249_v33  ;;  %v1083_v10 = vmul.f32 %v2103_v22, %v1739_v36  ;;  %v2667_v50 = vld [vmem:[#allocation15_spill] sm:$0xff] }
 0x162   :  { %2663 = vst [vmem:[#allocation20_spill] sm:$0xff] %v2265_v30  ;;  %vm233_vm9 = vcmp.gt.f32.partialorder %v225_v14, 1e-16  ;;  %vm241_vm3 = vcmp.lt.f32.partialorder %v225_v14, 105.542725  ;;  %v540_v20 = vmul.f32 %v532_v12, %v2215_v35  ;;  %v1043_v32 = vsub.f32 0.0, %v915_v52 }
 0x163   :  { %v1025_v25 = vadd.f32 0.2548296, %v1017_v5  ;;  %v1193_v8 = vadd.f32 0.2548296, %v1185_v38  ;;  %vm2271_vm10 = vmand %vm233_vm9, %vm241_vm3  ;;  %v2664_v61 = vmov 0  ;;  %v633_v2 = vmul.f32 %v2667_v50, %v625_v49 }
 0x164   :  { %v2665_v61 = vsel %vm2271_vm10, 4294967295, %v2664_v61  ;;  %v972_v23 = vmul.f32 1.0614054, %v2256_v56  ;;  %v607_v58 = vmul.f32 1.442695, %v595_v44  ;;  %v2279_v19 = vsel %vm2271_vm10, %v225_v14, 1.0 }
 0x165   :  { %2666 = vst [vmem:[#allocation11_spill] sm:$0xff] %v2665_v61  ;;  %v368_v22 = vadd.f32 1.4214138, %v360_v40  ;;  %v1140_v5 = vmul.f32 1.0614054, %v2261_v60  ;;  %1489 = vrsqrt.f32 %v2279_v19  ;;  %v1211_v38 = vsub.f32 0.0, %v1083_v10 }
 0x166   :  { %v523_v59 = vmul.f32 1.0614054, %v2263_v7  ;;  %v351_v34 = vadd.f32 -1.4531521, %v343_v29  ;;  %1491 = vpow2.f32 %v2200_v17  ;;  %v813_v12 = vadd.f32 %v805_v46, %v1648_v28 }
 0x167   :  { %v1033_v52 = vmul.f32 %v1025_v25, %v2125_v31  ;;  %v1201_v44 = vmul.f32 %v1193_v8, %v2127_v55  ;;  %v548_v49 = vadd.f32 1.4214138, %v540_v20  ;;  %v1055_v14 = vmul.f32 1.442695, %v1043_v32 }
 0x168   :  { %v980_v54 = vadd.f32 -1.4531521, %v972_v23  ;;  %1493 = vpow2.f32 %v607_v58  ;;  %v641_v28 = vsel %vm1784_vm7, %v633_v2, 0.0  ;;  %v376_v31 = vmul.f32 %v368_v22, %v2197_v11 }
 0x169   :  { %v2293_v29 = vpop.eup %1479  ;;  %v1148_v46 = vadd.f32 -1.4531521, %v1140_v5  ;;  %v531_v55 = vadd.f32 -1.4531521, %v523_v59  ;;  %v359_v25 = vmul.f32 %v351_v34, %v2249_v33  ;;  %v2299_v8 = vmul.f32 1.442695, %v1211_v38 }
 0x16a   :  { %2669 = vst [vmem:[#allocation15_spill] sm:$0xff] %v2293_v29  ;;  %v1482_v10 = vpop.eup %1481  ;;  %v902_v20 = vmul.f32 %v2293_v29, %v2229_v18  ;;  %v853_v32 = vadd.f32 %v2156_v45, %v813_v12  ;;  %v2305_v58 = vmul.f32 %v2212_v53, %v1033_v52  ;;  %v2308_v2 = vmul.f32 %v2218_v62, %v1201_v44 }
 0x16b   :  { %v1484_v23 = vpop.eup %1483  ;;  %v556_v22 = vmul.f32 %v548_v49, %v2215_v35  ;;  %1495 = vpow2.f32 %v1055_v14  ;;  %v2312_v59 = vadd.f32 %v2074_v4, %v641_v28  ;;  %v988_v34 = vmul.f32 %v980_v54, %v2256_v56 }
 0x16c   :  { %v1486_v5 = vpop.eup %1485  ;;  %v2316_v38 = vmul.f32 0.17453292, %v2141_v47  ;;  %v910_v45 = vmul.f32 0.41777137, %v902_v20  ;;  %v384_v17 = vadd.f32 -0.28449672, %v376_v31  ;;  %v1156_v53 = vmul.f32 %v1148_v46, %v2261_v60 }
 0x16d   :  { %v1488_v12 = vpop.eup %1487  ;;  %v539_v62 = vmul.f32 %v531_v55, %v2263_v7  ;;  %v1078_v52 = vmul.f32 %v902_v20, %v2643_v13  ;;  %v367_v44 = vadd.f32 1.4214138, %v359_v25  ;;  %v947_v49 = vmul.f32 %v1482_v10, %v2225_v63 }
 0x16e   :  { %v926_v14 = vmul.f32 0.3275911, %v910_v45  ;;  %vm861_vm7 = vcmp.gt.f32.partialorder %v853_v32, 1e-16  ;;  %v564_v4 = vadd.f32 -0.28449672, %v556_v22  ;;  %v322_v54 = vmul.f32 %v1484_v23, %v2231_v42 }
 0x16f   :  { %v502_v28 = vmul.f32 %v1486_v5, %v2237_v27  ;;  %v1094_v26 = vmul.f32 0.3275911, %v1078_v52  ;;  %v996_v50 = vadd.f32 1.4214138, %v988_v34  ;;  %v1115_v31 = vmul.f32 %v1488_v12, %v2242_v24 }
 0x170   :  { %v2325_v29 = vadd.f32 1.0, %v926_v14  ;;  %vm869_vm14 = vcmp.lt.f32.partialorder %v853_v32, 105.542725  ;;  %v1241_v46 = vsub.f32 %v2305_v58, %v2308_v2  ;;  %v1164_v55 = vadd.f32 1.4214138, %v1156_v53 }
 0x171   :  { %v547_v25 = vadd.f32 1.4214138, %v539_v62  ;;  %v2329_v63 = vadd.f32 1.0, %v1094_v26  ;;  %vm2331_vm9 = vmand %vm861_vm7, %vm869_vm14  ;;  %v2671_v20 = vmov 0  ;;  %v375_v27 = vmul.f32 %v367_v44, %v2249_v33 }
 0x172   :  { %v2672_v20 = vsel %vm2331_vm9, 4294967295, %v2671_v20  ;;  %v2335_v42 = vpop.eup %1489  ;;  %v955_v22 = vsub.f32 2.0, %v947_v49  ;;  %1497 = vrcp.f32 %v2325_v29  ;;  %v2341_v24 = vsel %vm2331_vm9, %v853_v32, 1.0 }
 0x173   :  { %2673 = vst [vmem:[#allocation9_spill] sm:$0xff] %v2672_v20  ;;  %v2343_v58 = vpop.eup %1491  ;;  %v330_v2 = vsub.f32 2.0, %v322_v54  ;;  %v510_v26 = vsub.f32 2.0, %v502_v28  ;;  %1499 = vrcp.f32 %v2329_v63  ;;  %v273_v34 = vmul.f32 %v2335_v42, %v2279_v19 }
 0x174   :  { %v392_v45 = vmul.f32 %v384_v17, %v2197_v11  ;;  %v572_v53 = vmul.f32 %v564_v4, %v2215_v35  ;;  %v1123_v62 = vsub.f32 2.0, %v1115_v31  ;;  %1501 = vrsqrt.f32 %v2341_v24 }
 0x175   :  { %v2351_v52 = vpop.eup %1493  ;;  %v1004_v32 = vmul.f32 %v996_v50, %v2256_v56  ;;  %v555_v44 = vmul.f32 %v547_v25, %v2263_v7  ;;  %v281_v49 = vmul.f32 0.41777137, %v273_v34  ;;  %v455_v14 = vmul.f32 %v2643_v13, %v273_v34 }
 0x176   :  { %v1172_v54 = vmul.f32 %v1164_v55, %v2261_v60  ;;  %v383_v28 = vadd.f32 -0.28449672, %v375_v27  ;;  %v2357_v20 = vmul.f32 %v1482_v10, %v955_v22  ;;  %v418_v17 = vsub.f32 0.0, %v2316_v38 }
 0x177   :  { %v2360_v4 = vmul.f32 %v1484_v23, %v330_v2  ;;  %v2362_v31 = vmul.f32 %v1486_v5, %v510_v26  ;;  %v297_v61 = vmul.f32 0.3275911, %v281_v49  ;;  %v477_v41 = vmul.f32 0.3275911, %v455_v14  ;;  %v2674_v23 = vld [vmem:[#allocation16_spill] sm:$0xff] }
 0x178   :  { %v2364_v6 = vpop.eup %1495  ;;  %v400_v50 = vadd.f32 0.2548296, %v392_v45  ;;  %v580_v25 = vadd.f32 0.2548296, %v572_v53  ;;  %v2366_v30 = vmul.f32 %v1488_v12, %v1123_v62  ;;  %v470_v55 = vmul.f32 %v1739_v36, %v2141_v47 }
 0x179   :  { %v1012_v27 = vadd.f32 -0.28449672, %v1004_v32  ;;  %v563_v10 = vadd.f32 -0.28449672, %v555_v44  ;;  %v2370_v22 = vadd.f32 1.0, %v297_v61  ;;  %v2372_v38 = vadd.f32 1.0, %v477_v41 }
 0x17a   :  { %v2375_v5 = vmul.f32 %v2674_v23, %v1241_v46  ;;  %v1180_v2 = vadd.f32 -0.28449672, %v1172_v54  ;;  %v971_v26 = vmul.f32 1.0614054, %v2357_v20  ;;  %v433_v34 = vmul.f32 1.442695, %v418_v17 }
 0x17b   :  { %v391_v45 = vmul.f32 %v383_v28, %v2249_v33  ;;  %v346_v12 = vmul.f32 1.0614054, %v2360_v4  ;;  %v526_v53 = vmul.f32 1.0614054, %v2362_v31  ;;  %1503 = vrcp.f32 %v2370_v22 }
 0x17c   :  { %v408_v47 = vmul.f32 %v400_v50, %v2197_v11  ;;  %v1139_v41 = vmul.f32 1.0614054, %v2366_v30  ;;  %v598_v61 = vsub.f32 0.0, %v470_v55  ;;  %1505 = vrcp.f32 %v2372_v38 }
 0x17d   :  { %v588_v46 = vmul.f32 %v580_v25, %v2215_v35  ;;  %v1020_v62 = vmul.f32 %v1012_v27, %v2256_v56  ;;  %v571_v32 = vmul.f32 %v563_v10, %v2263_v7  ;;  %1507 = vpow2.f32 %v2299_v8 }
 0x17e   :  { %v1188_v14 = vmul.f32 %v1180_v2, %v2261_v60  ;;  %v2676_v11 = vsel %vm1715_vm15, %v2183_v48, 0.0  ;;  %v979_v35 = vadd.f32 -1.4531521, %v971_v26  ;;  %v399_v17 = vadd.f32 0.2548296, %v391_v45 }
 0x17f   :  { %v2398_v54 = vadd.f32 %v2312_v59, %v2676_v11  ;;  %v1498_v28 = vpop.eup %1497  ;;  %v354_v50 = vadd.f32 -1.4531521, %v346_v12  ;;  %1509 = vpow2.f32 %v433_v34  ;;  %v534_v25 = vadd.f32 -1.4531521, %v526_v53 }
 0x180   :  { %v1500_v8 = vpop.eup %1499  ;;  %v2401_v55 = vmul.f32 %v2233_v15, %v408_v47  ;;  %v1147_v27 = vadd.f32 -1.4531521, %v1139_v41  ;;  %v2403_v10 = vmul.f32 1.442695, %v598_v61  ;;  %v950_v40 = vmul.f32 %v1498_v28, %v2325_v29 }
 0x181   :  { %v2406_v23 = vpop.eup %1501  ;;  %v2409_v48 = vmul.f32 %v2239_v57, %v588_v46  ;;  %v2411_v59 = vadd.f32 0.2548296, %v1020_v62  ;;  %v579_v2 = vadd.f32 0.2548296, %v571_v32  ;;  %v1118_v26 = vmul.f32 %v1500_v8, %v2329_v63 }
 0x182   :  { %2677 = vst [vmem:[#allocation12_spill] sm:$0xff] %v2406_v23  ;;  %v2414_v34 = vadd.f32 0.2548296, %v1188_v14  ;;  %v987_v15 = vmul.f32 %v979_v35, %v2357_v20  ;;  %v958_v45 = vsub.f32 2.0, %v950_v40  ;;  %v901_v12 = vmul.f32 %v2406_v23, %v2341_v24 }
 0x183   :  { %v407_v29 = vmul.f32 %v399_v17, %v2249_v33  ;;  %v362_v53 = vmul.f32 %v354_v50, %v2360_v4  ;;  %v542_v57 = vmul.f32 %v534_v25, %v2362_v31  ;;  %v1126_v47 = vsub.f32 2.0, %v1118_v26 }
 0x184   :  { %v1155_v41 = vmul.f32 %v1147_v27, %v2366_v30  ;;  %v918_v61 = vmul.f32 0.17453292, %v2229_v18  ;;  %v909_v63 = vmul.f32 0.41777137, %v901_v12  ;;  %v1077_v46 = vmul.f32 %v901_v12, %v2643_v13 }
 0x185   :  { %v587_v62 = vmul.f32 %v579_v2, %v2263_v7  ;;  %v2426_v32 = vmul.f32 %v1498_v28, %v958_v45  ;;  %v2428_v14 = vmul.f32 %v1500_v8, %v1126_v47  ;;  %v289_v33 = vmul.f32 0.17453292, %v2279_v19 }
 0x186   :  { %v628_v11 = vsub.f32 %v2401_v55, %v2409_v48  ;;  %v995_v35 = vadd.f32 1.4214138, %v987_v15  ;;  %v925_v17 = vmul.f32 0.3275911, %v909_v63  ;;  %v1093_v50 = vmul.f32 0.3275911, %v1077_v46 }
 0x187   :  { %v439_v25 = vmul.f32 %v2343_v58, %v407_v29  ;;  %v370_v27 = vadd.f32 1.4214138, %v362_v53  ;;  %v550_v40 = vadd.f32 1.4214138, %v542_v57  ;;  %v1086_v13 = vmul.f32 %v2229_v18, %v1739_v36 }
 0x188   :  { %v1504_v7 = vpop.eup %1503  ;;  %v1163_v28 = vadd.f32 1.4214138, %v1155_v41  ;;  %v469_v8 = vmul.f32 %v1739_v36, %v2279_v19  ;;  %v2438_v2 = vadd.f32 1.0, %v925_v17  ;;  %v2440_v26 = vadd.f32 1.0, %v1093_v50 }
 0x189   :  { %v1506_v55 = vpop.eup %1505  ;;  %v619_v48 = vmul.f32 %v2351_v52, %v587_v62  ;;  %v974_v15 = vmul.f32 1.0614054, %v2426_v32  ;;  %v1142_v58 = vmul.f32 1.0614054, %v2428_v14  ;;  %v321_v45 = vmul.f32 %v1504_v7, %v2370_v22 }
 0x18a   :  { %v2446_v12 = vpop.eup %1507  ;;  %v1003_v18 = vmul.f32 %v995_v35, %v2357_v20  ;;  %v417_v29 = vsub.f32 0.0, %v289_v33  ;;  %v501_v19 = vmul.f32 %v1506_v55, %v2372_v38  ;;  %1511 = vrcp.f32 %v2438_v2 }
 0x18b   :  { %v378_v53 = vmul.f32 %v370_v27, %v2360_v4  ;;  %v558_v57 = vmul.f32 %v550_v40, %v2362_v31  ;;  %v329_v52 = vsub.f32 2.0, %v321_v45  ;;  %1513 = vrcp.f32 %v2440_v26 }
 0x18c   :  { %v2454_v47 = vpop.eup %1509  ;;  %v1171_v22 = vmul.f32 %v1163_v28, %v2366_v30  ;;  %v1046_v41 = vsub.f32 0.0, %v918_v61  ;;  %v509_v63 = vsub.f32 2.0, %v501_v19  ;;  %v597_v46 = vsub.f32 0.0, %v469_v8 }
 0x18d   :  { %v982_v62 = vadd.f32 -1.4531521, %v974_v15  ;;  %v1150_v33 = vadd.f32 -1.4531521, %v1142_v58  ;;  %v1214_v35 = vsub.f32 0.0, %v1086_v13  ;;  %v2457_v38 = vmul.f32 %v1504_v7, %v329_v52 }
 0x18e   :  { %v627_v17 = vsub.f32 %v439_v25, %v619_v48  ;;  %v1011_v50 = vadd.f32 -0.28449672, %v1003_v18  ;;  %v431_v27 = vmul.f32 1.442695, %v417_v29  ;;  %v2459_v49 = vmul.f32 %v1506_v55, %v509_v63 }
 0x18f   :  { %v386_v40 = vadd.f32 -0.28449672, %v378_v53  ;;  %v566_v45 = vadd.f32 -0.28449672, %v558_v57  ;;  %1515 = vpow2.f32 %v2403_v10  ;;  %v345_v23 = vmul.f32 1.0614054, %v2457_v38 }
 0x190   :  { %v2464_v61 = vmul.f32 %v2019_v43, %v628_v11  ;;  %v1179_v28 = vadd.f32 -0.28449672, %v1171_v22  ;;  %v525_v8 = vmul.f32 1.0614054, %v2459_v49  ;;  %v611_v13 = vmul.f32 1.442695, %v597_v46 }
 0x191   :  { %v990_v7 = vmul.f32 %v982_v62, %v2426_v32  ;;  %v1061_v25 = vmul.f32 1.442695, %v1046_v41  ;;  %v1158_v48 = vmul.f32 %v1150_v33, %v2428_v14  ;;  %v353_v55 = vadd.f32 -1.4531521, %v345_v23 }
 0x192   :  { %v635_v15 = vmul.f32 %v2069_v9, %v627_v17  ;;  %v1019_v58 = vmul.f32 %v1011_v50, %v2357_v20  ;;  %v1229_v10 = vmul.f32 1.442695, %v1214_v35  ;;  %v533_v18 = vadd.f32 -1.4531521, %v525_v8 }
 0x193   :  { %v394_v29 = vmul.f32 %v386_v40, %v2360_v4  ;;  %v574_v43 = vmul.f32 %v566_v45, %v2362_v31  ;;  %v361_v11 = vmul.f32 %v353_v55, %v2457_v38  ;;  %1517 = vpow2.f32 %v431_v27 }
 0x194   :  { %v1187_v19 = vmul.f32 %v1179_v28, %v2366_v30  ;;  %v541_v53 = vmul.f32 %v533_v18, %v2459_v49  ;;  %1519 = vpow2.f32 %v611_v13  ;;  %v917_v23 = vmul.f32 0.17453292, %v2341_v24 }
 0x195   :  { %v998_v57 = vadd.f32 1.4214138, %v990_v7  ;;  %1521 = vpow2.f32 %v1061_v25  ;;  %v1166_v9 = vadd.f32 1.4214138, %v1158_v48  ;;  %v369_v52 = vadd.f32 1.4214138, %v361_v11 }
 0x196   :  { %v1027_v22 = vadd.f32 0.2548296, %v1019_v58  ;;  %1523 = vpow2.f32 %v1229_v10  ;;  %v549_v41 = vadd.f32 1.4214138, %v541_v53  ;;  %v1085_v63 = vmul.f32 %v2341_v24, %v1739_v36 }
 0x197   :  { %v1512_v46 = vpop.eup %1511  ;;  %v643_v62 = vsel %vm1998_vm13, %v635_v15, 0.0  ;;  %v402_v33 = vadd.f32 0.2548296, %v394_v29  ;;  %v582_v35 = vadd.f32 0.2548296, %v574_v43  ;;  %v377_v17 = vmul.f32 %v369_v52, %v2457_v38 }
 0x198   :  { %v1514_v50 = vpop.eup %1513  ;;  %v1195_v27 = vadd.f32 0.2548296, %v1187_v19  ;;  %v557_v40 = vmul.f32 %v549_v41, %v2459_v49  ;;  %v949_v45 = vmul.f32 %v1512_v46, %v2438_v2  ;;  %v1045_v28 = vsub.f32 0.0, %v917_v23 }
 0x199   :  { %v1006_v8 = vmul.f32 %v998_v57, %v2426_v32  ;;  %v1174_v13 = vmul.f32 %v1166_v9, %v2428_v14  ;;  %v385_v36 = vadd.f32 -0.28449672, %v377_v17  ;;  %v1117_v24 = vmul.f32 %v1514_v50, %v2440_v26 }
 0x19a   :  { %v1035_v51 = vmul.f32 %v1027_v22, %v2357_v20  ;;  %v565_v7 = vadd.f32 -0.28449672, %v557_v40  ;;  %v957_v25 = vsub.f32 2.0, %v949_v45  ;;  %v1213_v48 = vsub.f32 0.0, %v1085_v63 }
 0x19b   :  { %v410_v55 = vmul.f32 %v402_v33, %v2360_v4  ;;  %v590_v15 = vmul.f32 %v582_v35, %v2362_v31  ;;  %v393_v58 = vmul.f32 %v385_v36, %v2457_v38  ;;  %v1125_v2 = vsub.f32 2.0, %v1117_v24 }
 0x19c   :  { %v1516_v10 = vpop.eup %1515  ;;  %v1203_v18 = vmul.f32 %v1195_v27, %v2366_v30  ;;  %v573_v29 = vmul.f32 %v565_v7, %v2459_v49  ;;  %v2493_v43 = vmul.f32 %v1512_v46, %v957_v25  ;;  %v1059_v26 = vmul.f32 1.442695, %v1045_v28 }
 0x19d   :  { %v1014_v11 = vadd.f32 -0.28449672, %v1006_v8  ;;  %v1182_v20 = vadd.f32 -0.28449672, %v1174_v13  ;;  %v401_v19 = vadd.f32 0.2548296, %v393_v58  ;;  %v2495_v53 = vmul.f32 %v1514_v50, %v1125_v2 }
 0x19e   :  { %v650_v4 = vadd.f32 %v2398_v54, %v643_v62  ;;  %v581_v23 = vadd.f32 0.2548296, %v573_v29  ;;  %v973_v31 = vmul.f32 1.0614054, %v2493_v43  ;;  %v1227_v57 = vmul.f32 1.442695, %v1213_v48 }
 0x19f   :  { %v442_v9 = vmul.f32 %v2454_v47, %v410_v55  ;;  %v622_v52 = vmul.f32 %v1516_v10, %v590_v15  ;;  %v409_v30 = vmul.f32 %v401_v19, %v2457_v38  ;;  %v1141_v22 = vmul.f32 1.0614054, %v2495_v53  ;;  %v2684_v29 = vld [vmem:[#allocation18_spill] sm:$0xff] }
 0x1a0   :  { %v1518_v41 = vpop.eup %1517  ;;  %v1067_v63 = vmul.f32 %v2364_v6, %v1035_v51  ;;  %v1235_v46 = vmul.f32 %v2446_v12, %v1203_v18  ;;  %v589_v33 = vmul.f32 %v581_v23, %v2459_v49  ;;  %v981_v35 = vadd.f32 -1.4531521, %v973_v31  ;;  %v2683_v18 = vld [vmem:[#allocation20_spill] sm:$0xff] }
 0x1a1   :  { %v1520_v54 = vpop.eup %1519  ;;  %v1022_v62 = vmul.f32 %v1014_v11, %v2426_v32  ;;  %v1190_v17 = vmul.f32 %v1182_v20, %v2428_v14  ;;  %v441_v50 = vmul.f32 %v1518_v41, %v409_v30  ;;  %v1149_v47 = vadd.f32 -1.4531521, %v1141_v22 }
 0x1a2   :  { %v1522_v27 = vpop.eup %1521  ;;  %v1036_v38 = vmul.f32 %v2411_v59, %v2256_v56  ;;  %v621_v40 = vmul.f32 %v1520_v54, %v589_v33  ;;  %v989_v45 = vmul.f32 %v981_v35, %v2493_v43  ;;  %1525 = vpow2.f32 %v1059_v26 }
 0x1a3   :  { %v1524_v6 = vpop.eup %1523  ;;  %v1204_v49 = vmul.f32 %v2414_v34, %v2261_v60  ;;  %v630_v12 = vsub.f32 %v442_v9, %v622_v52  ;;  %v1157_v28 = vmul.f32 %v1149_v47, %v2495_v53  ;;  %1527 = vpow2.f32 %v1227_v57 }
 0x1a4   :  { %v644_v13 = vsel %vm1933_vm0, %v2464_v61, 0.0  ;;  %v1243_v36 = vsub.f32 %v1067_v63, %v1235_v46  ;;  %v629_v24 = vsub.f32 %v441_v50, %v621_v40  ;;  %v997_v51 = vadd.f32 1.4214138, %v989_v45  ;;  %v2682_v61 = vld [vmem:[#allocation13_spill] sm:$0xff] }
 0x1a5   :  { %v1030_v56 = vadd.f32 0.2548296, %v1022_v62  ;;  %v1198_v59 = vadd.f32 0.2548296, %v1190_v17  ;;  %v651_v7 = vadd.f32 %v650_v4, %v644_v13  ;;  %v1165_v25 = vadd.f32 1.4214138, %v1157_v28 }
 0x1a6   :  { %v2679_v48 = vsel %vm1681_vm12, %v2057_v3, 0.0  ;;  %v2680_v60 = vsel %vm1662_vm6, %v2051_v0, 0.0  ;;  %v2681_v55 = vsub.f32 %v2179_v37, %v2186_v39  ;;  %v637_v58 = vmul.f32 %v2335_v42, %v629_v24  ;;  %v2686_v37 = vld [vmem:[#allocation7_spill] sm:$0xff]  ;;  %v2691_v17 = vld [vmem:[#allocation8_spill] sm:$0xff] }
 0x1a7   :  { %v1263_v34 = vadd.f32 %v2680_v60, %v2679_v48  ;;  %v1005_v2 = vmul.f32 %v997_v51, %v2493_v43  ;;  %v1068_v10 = vmul.f32 %v2246_v21, %v1036_v38  ;;  %v1236_v1 = vmul.f32 %v2683_v18, %v1204_v49  ;;  %v2693_v24 = vld [vmem:[#allocation15_spill] sm:$0xff] }
 0x1a8   :  { %v1250_v15 = vmul.f32 %v2682_v61, %v2681_v55  ;;  %v638_v3 = vmul.f32 %v2684_v29, %v630_v12  ;;  %v1173_v16 = vmul.f32 %v1165_v25, %v2495_v53  ;;  %v2685_v0 = vsel %vm1855_vm11, %v2375_v5, 0.0 }
 0x1a9   :  { %v1264_v26 = vadd.f32 %v1263_v34, %v2685_v0  ;;  %v1251_v39 = vmul.f32 %v2686_v37, %v1243_v36  ;;  %v645_v42 = vsel %vm2271_vm10, %v637_v58, 0.0  ;;  %v1013_v20 = vadd.f32 -0.28449672, %v1005_v2 }
 0x1aa   :  { %v1038_v19 = vmul.f32 %v1030_v56, %v2426_v32  ;;  %v1206_v21 = vmul.f32 %v1198_v59, %v2428_v14  ;;  %v652_v4 = vadd.f32 %v651_v7, %v645_v42  ;;  %v1181_v23 = vadd.f32 -0.28449672, %v1173_v16  ;;  %v1278_v16 = vld [vmem:[%s2570_s2] sm:$0x1] }
 0x1ab   :  { %v1021_v31 = vmul.f32 %v1013_v20, %v2493_v43  ;;  %v1258_v44 = vsel %vm1759_vm2, %v1250_v15, 0.0  ;;  %v1244_v9 = vsub.f32 %v1068_v10, %v1236_v1  ;;  %v646_v52 = vsel %vm2131_vm8, %v638_v3, 0.0 }
 0x1ac   :  { %v1189_v30 = vmul.f32 %v1181_v23, %v2495_v53  ;;  %v1265_v22 = vadd.f32 %v1264_v26, %v1258_v44  ;;  %v653_v63 = vadd.f32 %v652_v4, %v646_v52  ;;  %v1259_v32 = vsel %vm2086_vm4, %v1251_v39, 0.0 }
 0x1ad   :  { %v1029_v41 = vadd.f32 0.2548296, %v1021_v31  ;;  %v1070_v14 = vmul.f32 %v1522_v27, %v1038_v19  ;;  %v1238_v33 = vmul.f32 %v1524_v6, %v1206_v21  ;;  %v1252_v50 = vmul.f32 %v2691_v17, %v1244_v9 }
 0x1ae   :  { %v1197_v35 = vadd.f32 0.2548296, %v1189_v30  ;;  %v1266_v40 = vadd.f32 %v1265_v22, %v1259_v32  ;;  %v654_v49 = vrot.slane %v653_v63, 4 }
 0x1af   :  { %v1037_v54 = vmul.f32 %v1029_v41, %v2493_v43  ;;  %v1526_v62 = vpop.eup %1525  ;;  %v1246_v12 = vsub.f32 %v1070_v14, %v1238_v33  ;;  %v1260_v13 = vsel %vm1979_vm5, %v1252_v50, 0.0  ;;  %v2694_v43 = vld [vmem:[#allocation12_spill] sm:$0xff] }
 0x1b0   :  { %v1205_v47 = vmul.f32 %v1197_v35, %v2495_v53  ;;  %v1528_v38 = vpop.eup %1527  ;;  %v1267_v27 = vadd.f32 %v1266_v40, %v1260_v13  ;;  %v655_v6 = vadd.f32 %v654_v49, %v653_v63 }
 0x1b1   :  { %v1069_v45 = vmul.f32 %v1526_v62, %v1037_v54  ;;  %v1254_v51 = vmul.f32 %v2693_v24, %v1246_v12 }
 0x1b2   :  { %v1237_v28 = vmul.f32 %v1528_v38, %v1205_v47  ;;  %v656_v25 = vrot.slane %v655_v6, 2 }
 0x1b3   :  { %v1262_v60 = vsel %vm2208_vm1, %v1254_v51, 0.0 }
 0x1b4   :  { %v1245_v36 = vsub.f32 %v1069_v45, %v1237_v28  ;;  %v657_v55 = vadd.f32 %v656_v25, %v655_v6 }
 0x1b6   :  { %v1253_v56 = vmul.f32 %v2694_v43, %v1245_v36  ;;  %v658_v58 = vrot.slane %v657_v55, 1 }
 0x1b8   :  { %v1261_v7 = vsel %vm2331_vm9, %v1253_v56, 0.0  ;;  %v659_v18 = vadd.f32 %v658_v58, %v657_v55 }
 0x1b9   :  { %v1268_v53 = vadd.f32 %v1267_v27, %v1261_v7 }
 0x1bb   :  { %v1269_v34 = vadd.f32 %v1268_v53, %v1262_v60 }
 0x1bd   :  { %v1270_v61 = vrot.slane %v1269_v34, 4 }
 0x1bf   :  { %v1271_v15 = vadd.f32 %v1270_v61, %v1269_v34 }
 0x1c1   :  { %v1272_v2 = vrot.slane %v1271_v15, 2 }
 0x1c3   :  { %v1273_v10 = vadd.f32 %v1272_v2, %v1271_v15 }
 0x1c5   :  { %v1274_v1 = vrot.slane %v1273_v10, 1 }
 0x1c7   :  { %v1275_v29 = vadd.f32 %v1274_v1, %v1273_v10 }
 0x1c9   :  { %v1276_v3 = vadd.f32 %v1275_v29, %v659_v18 }
 0x1cb   :  { %v1277_v0 = vmul.f32 14.399646, %v1276_v3 }
 0x1cd   :  { %v1279_v26 = vadd.f32 %v1278_v16, %v1277_v0 }
 0x1cf   :  { %1280 = vst [vmem:[#allocation2] sm:$0x1] %v1279_v26 }
 0x1d0   :  { %1540 = shalt.err (!%p1537_p4)
}
 0x1d1   :  { %1290 = dma.vmem_to_hbm [thread:$0]  %s1288_s0, 16, %s2572_s4, [#allocation3]  }
 0x1d2   :  { %1549 = dma.done.wait [#allocation3], 16  }
 0x1d3   :  { %1550 = vsyncadd [#allocation3], 4294967280 }
 0x1d4   :  { %1294 = vsyncpa [#allocation3], 1 }

</bundles_post_ra>
